<compile_context>
chip_gen: v5e
topology: v5e:2x2
jax: 0.10.0
libtpu: 0.0.40
codegen_flags: <defaults>
</compile_context>

<pallas_src>
import math

import jax
import jax.numpy as jnp
from jax import lax
from jax.experimental import pallas as pl
from jax.experimental.pallas import tpu as pltpu

# ---------------- small, module-consistent config ----------------
SEQ, BATCH = 8, 2
ROWS = SEQ * BATCH                       # flattened (s-major) token rows = 16
D_MODEL, NHEAD, D_HID, NLAYERS = 32, 4, 64, 2
NTOKEN = 40
NPAD = 128                               # lane-dense padded vocab width
HEAD_DIM = D_MODEL // NHEAD              # 8
HROWS = NHEAD * ROWS                     # lane-packed (head, kv-row) axis = 64
EPS = 1e-5                               # PyTorch LayerNorm default
PREC = lax.Precision.HIGHEST             # reference-side matmul precision


def _layer_norm(x, w, b):
    mu = jnp.mean(x, axis=-1, keepdims=True)
    var = jnp.mean((x - mu) ** 2, axis=-1, keepdims=True)
    return (x - mu) * lax.rsqrt(var + EPS) * w + b


# ---------------- Pallas kernel: whole model, one invocation ----------------
def transformer_kernel(
    tok_ref,              # [ROWS, 1]      int32 tokens (row = s*BATCH + b)
    pe_ref,               # [ROWS, D]      positional encoding per row
    amask_ref,            # [ROWS, HROWS]  additive causal mask, tiled per head
    hmask_ref,            # [HROWS, D]     head block-selection mask (0/1)
    emb_ref,              # [NTOKEN, D]    embedding table
    wq_ref, bq_ref,       # [L, D, D], [L, 1, D]   (1/sqrt(hd) folded in)
    wk_ref, bk_ref,       # [L, D, D], [L, 1, D]
    wv_ref, bv_ref,       # [L, D, D], [L, 1, D]
    wo_ref, bo_ref,       # [L, D, D], [L, 1, D]
    ln1w_ref, ln1b_ref, ln2w_ref, ln2b_ref,   # [L, 1, D]
    ff1w_ref, ff1b_ref,   # [L, D, H_ff], [L, 1, H_ff]
    ff2w_ref, ff2b_ref,   # [L, H_ff, D], [L, 1, D]
    finw_ref, finb_ref,   # [D, NPAD], [1, NPAD]
    o_ref,                # [ROWS, NPAD]
):
    f32 = jnp.float32

    # ---- fused embedding gather (one-hot matmul) + sqrt(d) scale + pos enc ----
    tok = tok_ref[...]                                             # [ROWS, 1] int32
    vocab = lax.broadcasted_iota(jnp.int32, (ROWS, NTOKEN), 1)
    onehot = (tok == vocab).astype(f32)                            # [ROWS, NTOKEN]
    x = jnp.dot(onehot, emb_ref[...], preferred_element_type=f32)  # [ROWS, D]
    x = x * f32(math.sqrt(D_MODEL)) + pe_ref[...]

    # hoisted constants: loaded once, layer loop below is a static unroll
    amask = amask_ref[...]                                         # [ROWS, HROWS]
    hmask = hmask_ref[...]                                         # [HROWS, D]

    for l in range(NLAYERS):  # static unroll over layers
        # ----- q/k/v projections (attention scale pre-folded into wq/bq) -----
        q = jnp.dot(x, wq_ref[l], preferred_element_type=f32) + bq_ref[l]  # [ROWS, D]
        k = jnp.dot(x, wk_ref[l], preferred_element_type=f32) + bk_ref[l]
        v = jnp.dot(x, wv_ref[l], preferred_element_type=f32) + bv_ref[l]

        # ----- lane-packed multi-head attention -----
        # Block-structured K / V: row h*ROWS + c holds k/v row c restricted to
        # head h's feature slice (sublane tile + constant mask, no lane slices).
        kb = jnp.concatenate([k] * NHEAD, axis=0) * hmask          # [HROWS, D]
        vb = jnp.concatenate([v] * NHEAD, axis=0) * hmask          # [HROWS, D]

        # scores for all heads in one NT matmul; head h lands in lane group
        # [h*ROWS, (h+1)*ROWS)
        s = lax.dot_general(q, kb, (((1,), (1,)), ((), ())),
                            preferred_element_type=f32) + amask    # [ROWS, HROWS]
        # global row max is a valid softmax shift (scores are O(1) here and the
        # per-head normalization below makes it exact up to f32 rounding)
        m = jnp.max(s, axis=-1, keepdims=True)
        p = jnp.exp(s - m)                                         # masked -> 0

        # un-normalized per-head context (already head-concatenated) and the
        # per-(row, head) denominator broadcast to that head's feature slice
        ctx = jnp.dot(p, vb, preferred_element_type=f32)           # [ROWS, D]
        den = jnp.dot(p, hmask, preferred_element_type=f32)        # [ROWS, D]
        ctx = ctx / den                                            # exact reciprocal

        attn = jnp.dot(ctx, wo_ref[l], preferred_element_type=f32) + bo_ref[l]

        # ----- residual + LayerNorm (post-norm) -----
        x = _layer_norm(x + attn, ln1w_ref[l], ln1b_ref[l])

        # ----- feed-forward (relu) -----
        h1 = jnp.maximum(
            jnp.dot(x, ff1w_ref[l], preferred_element_type=f32) + ff1b_ref[l], 0.0)
        h2 = jnp.dot(h1, ff2w_ref[l], preferred_element_type=f32) + ff2b_ref[l]
        x = _layer_norm(x + h2, ln2w_ref[l], ln2b_ref[l])

    # ----- final vocab projection (lane-dense, 128-wide padded) -----
    o_ref[...] = jnp.dot(x, finw_ref[...], preferred_element_type=f32) + finb_ref[...]


# ---------------- host-side parameter preparation for the kernel ----------------
def prepare_kernel_params(P):
    """Pre-split/transpose weights to [in, out], fold the attention scale into
    the Q projection, pad the final projection to 128 lanes, and build the
    trace-time constant masks (block-diag causal mask tiled per head, and the
    head block-selection mask for the lane-packed attention)."""
    f32 = jnp.float32

    # block-diagonal (per batch element) causal mask on the s-major row layout
    idx = jnp.arange(ROWS)
    s_idx, b_idx = idx // BATCH, idx % BATCH
    keep = (b_idx[:, None] == b_idx[None, :]) & (s_idx[None, :] <= s_idx[:, None])
    causal = jnp.where(keep, 0.0, -1e30).astype(f32)               # [ROWS, ROWS]
    amask = jnp.tile(causal, (1, NHEAD))                           # [ROWS, HROWS]

    # head block-selection mask: row h*ROWS+c selects feature slice of head h
    hmask = (jnp.arange(HROWS)[:, None] // ROWS
             == jnp.arange(D_MODEL)[None, :] // HEAD_DIM).astype(f32)   # [HROWS, D]

    scale = 1.0 / math.sqrt(HEAD_DIM)
    in_w_t = jnp.transpose(P["in_w"], (0, 2, 1))                   # [L, D, 3D]
    wq = in_w_t[:, :, :D_MODEL] * scale                            # scale folded in
    wk = in_w_t[:, :, D_MODEL:2 * D_MODEL]
    wv = in_w_t[:, :, 2 * D_MODEL:]
    bq = P["in_b"][:, :, :D_MODEL] * scale
    bk = P["in_b"][:, :, D_MODEL:2 * D_MODEL]
    bv = P["in_b"][:, :, 2 * D_MODEL:]

    fin_w = jnp.zeros((D_MODEL, NPAD), f32).at[:, :NTOKEN].set(P["fin_w"].T)
    fin_b = jnp.zeros((1, NPAD), f32).at[:, :NTOKEN].set(P["fin_b"])

    return dict(
        emb=P["emb"],
        pe=jnp.repeat(P["pe"], BATCH, axis=0),                     # [ROWS, D]
        amask=amask, hmask=hmask,
        wq=wq, bq=bq, wk=wk, bk=bk, wv=wv, bv=bv,
        wo=jnp.transpose(P["out_w"], (0, 2, 1)),                   # [L, D, D]
        bo=P["out_b"],
        ln1_w=P["ln1_w"], ln1_b=P["ln1_b"],
        ln2_w=P["ln2_w"], ln2_b=P["ln2_b"],
        ff1_w=jnp.transpose(P["ff1_w"], (0, 2, 1)),                # [L, D, H_ff]
        ff1_b=P["ff1_b"],
        ff2_w=jnp.transpose(P["ff2_w"], (0, 2, 1)),                # [L, H_ff, D]
        ff2_b=P["ff2_b"],
        fin_w=fin_w, fin_b=fin_b,
    )


# ---------------- wrapper ----------------
_VMEM_SPEC = pl.BlockSpec(memory_space=pltpu.MemorySpace.VMEM)


def transformer_forward(src, K):
    """src: int32 [S, B] -> float32 [S, B, NTOKEN]."""
    tok = src.reshape(ROWS, 1).astype(jnp.int32)   # s-major flatten: row = s*B + b

    args = (
        tok, K["pe"], K["amask"], K["hmask"], K["emb"],
        K["wq"], K["bq"], K["wk"], K["bk"], K["wv"], K["bv"], K["wo"], K["bo"],
        K["ln1_w"], K["ln1_b"], K["ln2_w"], K["ln2_b"],
        K["ff1_w"], K["ff1_b"], K["ff2_w"], K["ff2_b"],
        K["fin_w"], K["fin_b"],
    )
    out = pl.pallas_call(
        transformer_kernel,
        out_shape=jax.ShapeDtypeStruct((ROWS, NPAD), jnp.float32),
        # no grid: single invocation, whole (tiny) arrays staged once into VMEM
        in_specs=[_VMEM_SPEC] * len(args),
        out_specs=_VMEM_SPEC,
    )(*args)
    # rows are s-major -> free reshape to [S, B, NPAD]; drop lane padding
    return out.reshape(SEQ, BATCH, NPAD)[:, :, :NTOKEN]


transformer_forward_jit = jax.jit(transformer_forward)


# ---------------- pure-JAX reference (PyTorch-layout params) ----------------
def reference_forward(src, P):
    emb = P["emb"][src]                                          # [S, B, D]
    x = emb * math.sqrt(D_MODEL) + P["pe"][:, None, :]
    mask = jnp.where(
        jnp.arange(SEQ)[None, :] <= jnp.arange(SEQ)[:, None], 0.0, -jnp.inf
    )
    for l in range(NLAYERS):
        qkv = jnp.einsum("sbd,ed->sbe", x, P["in_w"][l], precision=PREC) + P["in_b"][l, 0]
        q, k, v = jnp.split(qkv, 3, axis=-1)

        def heads(t):  # [S,B,D] -> [B,H,S,hd]
            return t.reshape(SEQ, BATCH, NHEAD, HEAD_DIM).transpose(1, 2, 0, 3)

        qh, kh, vh = heads(q), heads(k), heads(v)
        s = jnp.einsum("bhqe,bhke->bhqk", qh, kh, precision=PREC) / math.sqrt(HEAD_DIM)
        s = s + mask
        p = jax.nn.softmax(s, axis=-1)
        o = jnp.einsum("bhqk,bhke->bhqe", p, vh, precision=PREC)
        o = o.transpose(2, 0, 1, 3).reshape(SEQ, BATCH, D_MODEL)
        attn = jnp.einsum("sbd,ed->sbe", o, P["out_w"][l], precision=PREC) + P["out_b"][l, 0]
        x = _layer_norm(x + attn, P["ln1_w"][l, 0], P["ln1_b"][l, 0])
        h1 = jax.nn.relu(
            jnp.einsum("sbd,hd->sbh", x, P["ff1_w"][l], precision=PREC) + P["ff1_b"][l, 0]
        )
        h2 = jnp.einsum("sbh,dh->sbd", h1, P["ff2_w"][l], precision=PREC) + P["ff2_b"][l, 0]
        x = _layer_norm(x + h2, P["ln2_w"][l, 0], P["ln2_b"][l, 0])
    return jnp.einsum("sbd,nd->sbn", x, P["fin_w"], precision=PREC) + P["fin_b"][0]


# ---------------- deterministic parameter construction (PyTorch layout) ----------------
def make_params(key):
    ks = jax.random.split(key, 12)
    initrange = 0.1
    f32 = jnp.float32

    # sinusoidal positional encoding (first SEQ rows of the buffer)
    position = jnp.arange(SEQ, dtype=f32)[:, None]
    div_term = jnp.exp(
        jnp.arange(0, D_MODEL, 2, dtype=f32) * (-math.log(10000.0) / D_MODEL)
    )
    pe = jnp.zeros((SEQ, D_MODEL), f32)
    pe = pe.at[:, 0::2].set(jnp.sin(position * div_term))
    pe = pe.at[:, 1::2].set(jnp.cos(position * div_term))

    P = {
        "emb": jax.random.uniform(ks[0], (NTOKEN, D_MODEL), f32, -initrange, initrange),
        "pe": pe,
        # per-layer stacked encoder weights (PyTorch [out, in] convention)
        "in_w": 0.05 * jax.random.normal(ks[1], (NLAYERS, 3 * D_MODEL, D_MODEL), f32),
        "in_b": 0.05 * jax.random.normal(ks[2], (NLAYERS, 1, 3 * D_MODEL), f32),
        "out_w": 0.05 * jax.random.normal(ks[3], (NLAYERS, D_MODEL, D_MODEL), f32),
        "out_b": 0.05 * jax.random.normal(ks[4], (NLAYERS, 1, D_MODEL), f32),
        "ln1_w": jnp.ones((NLAYERS, 1, D_MODEL), f32),
        "ln1_b": jnp.zeros((NLAYERS, 1, D_MODEL), f32),
        "ln2_w": jnp.ones((NLAYERS, 1, D_MODEL), f32),
        "ln2_b": jnp.zeros((NLAYERS, 1, D_MODEL), f32),
        "ff1_w": 0.05 * jax.random.normal(ks[5], (NLAYERS, D_HID, D_MODEL), f32),
        "ff1_b": 0.05 * jax.random.normal(ks[6], (NLAYERS, 1, D_HID), f32),
        "ff2_w": 0.05 * jax.random.normal(ks[7], (NLAYERS, D_MODEL, D_HID), f32),
        "ff2_b": 0.05 * jax.random.normal(ks[8], (NLAYERS, 1, D_MODEL), f32),
        # final Linear(d_model -> ntoken): uniform weights, zero bias (init_weights)
        "fin_w": jax.random.uniform(ks[9], (NTOKEN, D_MODEL), f32, -initrange, initrange),
        "fin_b": jnp.zeros((1, NTOKEN), f32),
    }
    return P


if __name__ == "__main__":
    key = jax.random.PRNGKey(0)
    pkey, skey = jax.random.split(key)
    params = make_params(pkey)
    kparams = prepare_kernel_params(params)
    src = jax.random.randint(skey, (SEQ, BATCH), 0, NTOKEN, dtype=jnp.int32)

    out = jax.block_until_ready(transformer_forward_jit(src, kparams))

    ref = reference_forward(src, params)
    assert out.shape == (SEQ, BATCH, NTOKEN), out.shape
    err = float(jnp.max(jnp.abs(out - ref)))
    # full-f32 kernel + exact softmax reciprocal -> tight tolerance
    assert jnp.allclose(out, ref, atol=1e-3, rtol=1e-3), err
    print("KERNEL_OK")
</pallas_src>

<mosaic_0001>
module attributes {stable_mosaic.version = 11 : i64} {
  func.func @transformer_kernel(%arg0: memref<16x1xi32, #tpu.memory_space<vmem>>, %arg1: memref<16x32xf32, #tpu.memory_space<vmem>>, %arg2: memref<16x64xf32, #tpu.memory_space<vmem>>, %arg3: memref<64x32xf32, #tpu.memory_space<vmem>>, %arg4: memref<40x32xf32, #tpu.memory_space<vmem>>, %arg5: memref<2x32x32xf32, #tpu.memory_space<vmem>>, %arg6: memref<2x1x32xf32, #tpu.memory_space<vmem>>, %arg7: memref<2x32x32xf32, #tpu.memory_space<vmem>>, %arg8: memref<2x1x32xf32, #tpu.memory_space<vmem>>, %arg9: memref<2x32x32xf32, #tpu.memory_space<vmem>>, %arg10: memref<2x1x32xf32, #tpu.memory_space<vmem>>, %arg11: memref<2x32x32xf32, #tpu.memory_space<vmem>>, %arg12: memref<2x1x32xf32, #tpu.memory_space<vmem>>, %arg13: memref<2x1x32xf32, #tpu.memory_space<vmem>>, %arg14: memref<2x1x32xf32, #tpu.memory_space<vmem>>, %arg15: memref<2x1x32xf32, #tpu.memory_space<vmem>>, %arg16: memref<2x1x32xf32, #tpu.memory_space<vmem>>, %arg17: memref<2x32x64xf32, #tpu.memory_space<vmem>>, %arg18: memref<2x1x64xf32, #tpu.memory_space<vmem>>, %arg19: memref<2x64x32xf32, #tpu.memory_space<vmem>>, %arg20: memref<2x1x32xf32, #tpu.memory_space<vmem>>, %arg21: memref<32x128xf32, #tpu.memory_space<vmem>>, %arg22: memref<1x128xf32, #tpu.memory_space<vmem>>, %arg23: memref<16x128xf32, #tpu.memory_space<vmem>>) attributes {dimension_semantics = [], scalar_prefetch = 0 : i64, scratch_operands = 0 : i64, tpu.core_type = #tpu.core_type<tc>} {
    %c0 = arith.constant 0 : index
    %c0_0 = arith.constant 0 : index
    %0 = vector.load %arg0[%c0, %c0_0] : memref<16x1xi32, #tpu.memory_space<vmem>>, vector<16x1xi32>
    %1 = tpu.iota {dimensions = array<i32: 1>} : vector<16x40xi32>
    %2 = vector.broadcast %0 : vector<16x1xi32> to vector<16x40xi32>
    %3 = arith.cmpi eq, %2, %1 : vector<16x40xi32>
    %4 = arith.extui %3 : vector<16x40xi1> to vector<16x40xi32>
    %5 = arith.sitofp %4 : vector<16x40xi32> to vector<16x40xf32>
    %c0_1 = arith.constant 0 : index
    %c0_2 = arith.constant 0 : index
    %6 = vector.load %arg4[%c0_1, %c0_2] : memref<40x32xf32, #tpu.memory_space<vmem>>, vector<40x32xf32>
    %cst = arith.constant dense<0.000000e+00> : vector<16x32xf32>
    %7 = tpu.matmul %5, %6, %cst {dimension_numbers = #tpu.dot_dimension_numbers<[1], [0], [0], [1], [0, 0, 1, 1], [], []>} : vector<16x40xf32>, vector<40x32xf32>, vector<16x32xf32> -> vector<16x32xf32>
    %cst_3 = arith.constant 5.65685415 : f32
    %8 = vector.broadcast %cst_3 : f32 to vector<16x32xf32>
    %9 = arith.mulf %7, %8 : vector<16x32xf32>
    %c0_4 = arith.constant 0 : index
    %c0_5 = arith.constant 0 : index
    %10 = vector.load %arg1[%c0_4, %c0_5] : memref<16x32xf32, #tpu.memory_space<vmem>>, vector<16x32xf32>
    %11 = arith.addf %9, %10 : vector<16x32xf32>
    %c0_6 = arith.constant 0 : index
    %c0_7 = arith.constant 0 : index
    %12 = vector.load %arg2[%c0_6, %c0_7] : memref<16x64xf32, #tpu.memory_space<vmem>>, vector<16x64xf32>
    %c0_8 = arith.constant 0 : index
    %c0_9 = arith.constant 0 : index
    %13 = vector.load %arg3[%c0_8, %c0_9] : memref<64x32xf32, #tpu.memory_space<vmem>>, vector<64x32xf32>
    %c0_10 = arith.constant 0 : index
    %c0_11 = arith.constant 0 : index
    %c0_12 = arith.constant 0 : index
    %14 = vector.load %arg5[%c0_10, %c0_11, %c0_12] : memref<2x32x32xf32, #tpu.memory_space<vmem>>, vector<1x32x32xf32>
    %15 = vector.shape_cast %14 : vector<1x32x32xf32> to vector<32x32xf32>
    %cst_13 = arith.constant dense<0.000000e+00> : vector<16x32xf32>
    %16 = tpu.matmul %11, %15, %cst_13 {dimension_numbers = #tpu.dot_dimension_numbers<[1], [0], [0], [1], [0, 0, 1, 1], [], []>} : vector<16x32xf32>, vector<32x32xf32>, vector<16x32xf32> -> vector<16x32xf32>
    %c0_14 = arith.constant 0 : index
    %c0_15 = arith.constant 0 : index
    %c0_16 = arith.constant 0 : index
    %17 = vector.load %arg6[%c0_14, %c0_15, %c0_16] : memref<2x1x32xf32, #tpu.memory_space<vmem>>, vector<1x1x32xf32>
    %18 = vector.shape_cast %17 : vector<1x1x32xf32> to vector<1x32xf32>
    %19 = vector.broadcast %18 : vector<1x32xf32> to vector<16x32xf32>
    %20 = arith.addf %16, %19 : vector<16x32xf32>
    %c0_17 = arith.constant 0 : index
    %c0_18 = arith.constant 0 : index
    %c0_19 = arith.constant 0 : index
    %21 = vector.load %arg7[%c0_17, %c0_18, %c0_19] : memref<2x32x32xf32, #tpu.memory_space<vmem>>, vector<1x32x32xf32>
    %22 = vector.shape_cast %21 : vector<1x32x32xf32> to vector<32x32xf32>
    %cst_20 = arith.constant dense<0.000000e+00> : vector<16x32xf32>
    %23 = tpu.matmul %11, %22, %cst_20 {dimension_numbers = #tpu.dot_dimension_numbers<[1], [0], [0], [1], [0, 0, 1, 1], [], []>} : vector<16x32xf32>, vector<32x32xf32>, vector<16x32xf32> -> vector<16x32xf32>
    %c0_21 = arith.constant 0 : index
    %c0_22 = arith.constant 0 : index
    %c0_23 = arith.constant 0 : index
    %24 = vector.load %arg8[%c0_21, %c0_22, %c0_23] : memref<2x1x32xf32, #tpu.memory_space<vmem>>, vector<1x1x32xf32>
    %25 = vector.shape_cast %24 : vector<1x1x32xf32> to vector<1x32xf32>
    %26 = vector.broadcast %25 : vector<1x32xf32> to vector<16x32xf32>
    %27 = arith.addf %23, %26 : vector<16x32xf32>
    %c0_24 = arith.constant 0 : index
    %c0_25 = arith.constant 0 : index
    %c0_26 = arith.constant 0 : index
    %28 = vector.load %arg9[%c0_24, %c0_25, %c0_26] : memref<2x32x32xf32, #tpu.memory_space<vmem>>, vector<1x32x32xf32>
    %29 = vector.shape_cast %28 : vector<1x32x32xf32> to vector<32x32xf32>
    %cst_27 = arith.constant dense<0.000000e+00> : vector<16x32xf32>
    %30 = tpu.matmul %11, %29, %cst_27 {dimension_numbers = #tpu.dot_dimension_numbers<[1], [0], [0], [1], [0, 0, 1, 1], [], []>} : vector<16x32xf32>, vector<32x32xf32>, vector<16x32xf32> -> vector<16x32xf32>
    %c0_28 = arith.constant 0 : index
    %c0_29 = arith.constant 0 : index
    %c0_30 = arith.constant 0 : index
    %31 = vector.load %arg10[%c0_28, %c0_29, %c0_30] : memref<2x1x32xf32, #tpu.memory_space<vmem>>, vector<1x1x32xf32>
    %32 = vector.shape_cast %31 : vector<1x1x32xf32> to vector<1x32xf32>
    %33 = vector.broadcast %32 : vector<1x32xf32> to vector<16x32xf32>
    %34 = arith.addf %30, %33 : vector<16x32xf32>
    %35 = tpu.concatenate %27, %27, %27, %27 in 0 : vector<16x32xf32>, vector<16x32xf32>, vector<16x32xf32>, vector<16x32xf32> -> vector<64x32xf32>
    %36 = arith.mulf %35, %13 : vector<64x32xf32>
    %37 = tpu.concatenate %34, %34, %34, %34 in 0 : vector<16x32xf32>, vector<16x32xf32>, vector<16x32xf32>, vector<16x32xf32> -> vector<64x32xf32>
    %38 = arith.mulf %37, %13 : vector<64x32xf32>
    %cst_31 = arith.constant dense<0.000000e+00> : vector<16x64xf32>
    %39 = tpu.matmul %20, %36, %cst_31 {dimension_numbers = #tpu.dot_dimension_numbers<[1], [1], [0], [0], [0, 0, 1, 0], [], []>} : vector<16x32xf32>, vector<64x32xf32>, vector<16x64xf32> -> vector<16x64xf32>
    %40 = arith.addf %39, %12 : vector<16x64xf32>
    %cst_32 = arith.constant dense<0xFF800000> : vector<16xf32>
    %41 = vector.multi_reduction <maximumf>, %40, %cst_32 [1] : vector<16x64xf32> to vector<16xf32>
    %42 = vector.shape_cast %41 : vector<16xf32> to vector<16x1xf32>
    %43 = vector.broadcast %42 : vector<16x1xf32> to vector<16x64xf32>
    %44 = arith.subf %40, %43 : vector<16x64xf32>
    %45 = math.exp %44 : vector<16x64xf32>
    %cst_33 = arith.constant dense<0.000000e+00> : vector<16x32xf32>
    %46 = tpu.matmul %45, %38, %cst_33 {dimension_numbers = #tpu.dot_dimension_numbers<[1], [0], [0], [1], [0, 0, 1, 1], [], []>} : vector<16x64xf32>, vector<64x32xf32>, vector<16x32xf32> -> vector<16x32xf32>
    %cst_34 = arith.constant dense<0.000000e+00> : vector<16x32xf32>
    %47 = tpu.matmul %45, %13, %cst_34 {dimension_numbers = #tpu.dot_dimension_numbers<[1], [0], [0], [1], [0, 0, 1, 1], [], []>} : vector<16x64xf32>, vector<64x32xf32>, vector<16x32xf32> -> vector<16x32xf32>
    %48 = arith.divf %46, %47 : vector<16x32xf32>
    %c0_35 = arith.constant 0 : index
    %c0_36 = arith.constant 0 : index
    %c0_37 = arith.constant 0 : index
    %49 = vector.load %arg11[%c0_35, %c0_36, %c0_37] : memref<2x32x32xf32, #tpu.memory_space<vmem>>, vector<1x32x32xf32>
    %50 = vector.shape_cast %49 : vector<1x32x32xf32> to vector<32x32xf32>
    %cst_38 = arith.constant dense<0.000000e+00> : vector<16x32xf32>
    %51 = tpu.matmul %48, %50, %cst_38 {dimension_numbers = #tpu.dot_dimension_numbers<[1], [0], [0], [1], [0, 0, 1, 1], [], []>} : vector<16x32xf32>, vector<32x32xf32>, vector<16x32xf32> -> vector<16x32xf32>
    %c0_39 = arith.constant 0 : index
    %c0_40 = arith.constant 0 : index
    %c0_41 = arith.constant 0 : index
    %52 = vector.load %arg12[%c0_39, %c0_40, %c0_41] : memref<2x1x32xf32, #tpu.memory_space<vmem>>, vector<1x1x32xf32>
    %53 = vector.shape_cast %52 : vector<1x1x32xf32> to vector<1x32xf32>
    %54 = vector.broadcast %53 : vector<1x32xf32> to vector<16x32xf32>
    %55 = arith.addf %51, %54 : vector<16x32xf32>
    %56 = arith.addf %11, %55 : vector<16x32xf32>
    %c0_42 = arith.constant 0 : index
    %c0_43 = arith.constant 0 : index
    %c0_44 = arith.constant 0 : index
    %57 = vector.load %arg13[%c0_42, %c0_43, %c0_44] : memref<2x1x32xf32, #tpu.memory_space<vmem>>, vector<1x1x32xf32>
    %58 = vector.shape_cast %57 : vector<1x1x32xf32> to vector<1x32xf32>
    %c0_45 = arith.constant 0 : index
    %c0_46 = arith.constant 0 : index
    %c0_47 = arith.constant 0 : index
    %59 = vector.load %arg14[%c0_45, %c0_46, %c0_47] : memref<2x1x32xf32, #tpu.memory_space<vmem>>, vector<1x1x32xf32>
    %60 = vector.shape_cast %59 : vector<1x1x32xf32> to vector<1x32xf32>
    %cst_48 = arith.constant dense<0.000000e+00> : vector<16xf32>
    %61 = vector.multi_reduction <add>, %56, %cst_48 [1] : vector<16x32xf32> to vector<16xf32>
    %62 = vector.shape_cast %61 : vector<16xf32> to vector<16x1xf32>
    %cst_49 = arith.constant 3.200000e+01 : f32
    %63 = vector.broadcast %cst_49 : f32 to vector<16x1xf32>
    %64 = arith.divf %62, %63 : vector<16x1xf32>
    %65 = vector.broadcast %64 : vector<16x1xf32> to vector<16x32xf32>
    %66 = arith.subf %56, %65 : vector<16x32xf32>
    %67 = arith.mulf %66, %66 : vector<16x32xf32>
    %cst_50 = arith.constant dense<0.000000e+00> : vector<16xf32>
    %68 = vector.multi_reduction <add>, %67, %cst_50 [1] : vector<16x32xf32> to vector<16xf32>
    %69 = vector.shape_cast %68 : vector<16xf32> to vector<16x1xf32>
    %cst_51 = arith.constant 3.200000e+01 : f32
    %70 = vector.broadcast %cst_51 : f32 to vector<16x1xf32>
    %71 = arith.divf %69, %70 : vector<16x1xf32>
    %72 = vector.broadcast %64 : vector<16x1xf32> to vector<16x32xf32>
    %73 = arith.subf %56, %72 : vector<16x32xf32>
    %cst_52 = arith.constant 9.99999974E-6 : f32
    %74 = vector.broadcast %cst_52 : f32 to vector<16x1xf32>
    %75 = arith.addf %71, %74 : vector<16x1xf32>
    %76 = math.rsqrt %75 : vector<16x1xf32>
    %77 = vector.broadcast %76 : vector<16x1xf32> to vector<16x32xf32>
    %78 = arith.mulf %73, %77 : vector<16x32xf32>
    %79 = vector.broadcast %58 : vector<1x32xf32> to vector<16x32xf32>
    %80 = arith.mulf %78, %79 : vector<16x32xf32>
    %81 = vector.broadcast %60 : vector<1x32xf32> to vector<16x32xf32>
    %82 = arith.addf %80, %81 : vector<16x32xf32>
    %c0_53 = arith.constant 0 : index
    %c0_54 = arith.constant 0 : index
    %c0_55 = arith.constant 0 : index
    %83 = vector.load %arg17[%c0_53, %c0_54, %c0_55] : memref<2x32x64xf32, #tpu.memory_space<vmem>>, vector<1x32x64xf32>
    %84 = vector.shape_cast %83 : vector<1x32x64xf32> to vector<32x64xf32>
    %cst_56 = arith.constant dense<0.000000e+00> : vector<16x64xf32>
    %85 = tpu.matmul %82, %84, %cst_56 {dimension_numbers = #tpu.dot_dimension_numbers<[1], [0], [0], [1], [0, 0, 1, 1], [], []>} : vector<16x32xf32>, vector<32x64xf32>, vector<16x64xf32> -> vector<16x64xf32>
    %c0_57 = arith.constant 0 : index
    %c0_58 = arith.constant 0 : index
    %c0_59 = arith.constant 0 : index
    %86 = vector.load %arg18[%c0_57, %c0_58, %c0_59] : memref<2x1x64xf32, #tpu.memory_space<vmem>>, vector<1x1x64xf32>
    %87 = vector.shape_cast %86 : vector<1x1x64xf32> to vector<1x64xf32>
    %88 = vector.broadcast %87 : vector<1x64xf32> to vector<16x64xf32>
    %89 = arith.addf %85, %88 : vector<16x64xf32>
    %cst_60 = arith.constant 0.000000e+00 : f32
    %90 = vector.broadcast %cst_60 : f32 to vector<16x64xf32>
    %91 = arith.maximumf %89, %90 : vector<16x64xf32>
    %c0_61 = arith.constant 0 : index
    %c0_62 = arith.constant 0 : index
    %c0_63 = arith.constant 0 : index
    %92 = vector.load %arg19[%c0_61, %c0_62, %c0_63] : memref<2x64x32xf32, #tpu.memory_space<vmem>>, vector<1x64x32xf32>
    %93 = vector.shape_cast %92 : vector<1x64x32xf32> to vector<64x32xf32>
    %cst_64 = arith.constant dense<0.000000e+00> : vector<16x32xf32>
    %94 = tpu.matmul %91, %93, %cst_64 {dimension_numbers = #tpu.dot_dimension_numbers<[1], [0], [0], [1], [0, 0, 1, 1], [], []>} : vector<16x64xf32>, vector<64x32xf32>, vector<16x32xf32> -> vector<16x32xf32>
    %c0_65 = arith.constant 0 : index
    %c0_66 = arith.constant 0 : index
    %c0_67 = arith.constant 0 : index
    %95 = vector.load %arg20[%c0_65, %c0_66, %c0_67] : memref<2x1x32xf32, #tpu.memory_space<vmem>>, vector<1x1x32xf32>
    %96 = vector.shape_cast %95 : vector<1x1x32xf32> to vector<1x32xf32>
    %97 = vector.broadcast %96 : vector<1x32xf32> to vector<16x32xf32>
    %98 = arith.addf %94, %97 : vector<16x32xf32>
    %99 = arith.addf %82, %98 : vector<16x32xf32>
    %c0_68 = arith.constant 0 : index
    %c0_69 = arith.constant 0 : index
    %c0_70 = arith.constant 0 : index
    %100 = vector.load %arg15[%c0_68, %c0_69, %c0_70] : memref<2x1x32xf32, #tpu.memory_space<vmem>>, vector<1x1x32xf32>
    %101 = vector.shape_cast %100 : vector<1x1x32xf32> to vector<1x32xf32>
    %c0_71 = arith.constant 0 : index
    %c0_72 = arith.constant 0 : index
    %c0_73 = arith.constant 0 : index
    %102 = vector.load %arg16[%c0_71, %c0_72, %c0_73] : memref<2x1x32xf32, #tpu.memory_space<vmem>>, vector<1x1x32xf32>
    %103 = vector.shape_cast %102 : vector<1x1x32xf32> to vector<1x32xf32>
    %cst_74 = arith.constant dense<0.000000e+00> : vector<16xf32>
    %104 = vector.multi_reduction <add>, %99, %cst_74 [1] : vector<16x32xf32> to vector<16xf32>
    %105 = vector.shape_cast %104 : vector<16xf32> to vector<16x1xf32>
    %cst_75 = arith.constant 3.200000e+01 : f32
    %106 = vector.broadcast %cst_75 : f32 to vector<16x1xf32>
    %107 = arith.divf %105, %106 : vector<16x1xf32>
    %108 = vector.broadcast %107 : vector<16x1xf32> to vector<16x32xf32>
    %109 = arith.subf %99, %108 : vector<16x32xf32>
    %110 = arith.mulf %109, %109 : vector<16x32xf32>
    %cst_76 = arith.constant dense<0.000000e+00> : vector<16xf32>
    %111 = vector.multi_reduction <add>, %110, %cst_76 [1] : vector<16x32xf32> to vector<16xf32>
    %112 = vector.shape_cast %111 : vector<16xf32> to vector<16x1xf32>
    %cst_77 = arith.constant 3.200000e+01 : f32
    %113 = vector.broadcast %cst_77 : f32 to vector<16x1xf32>
    %114 = arith.divf %112, %113 : vector<16x1xf32>
    %115 = vector.broadcast %107 : vector<16x1xf32> to vector<16x32xf32>
    %116 = arith.subf %99, %115 : vector<16x32xf32>
    %cst_78 = arith.constant 9.99999974E-6 : f32
    %117 = vector.broadcast %cst_78 : f32 to vector<16x1xf32>
    %118 = arith.addf %114, %117 : vector<16x1xf32>
    %119 = math.rsqrt %118 : vector<16x1xf32>
    %120 = vector.broadcast %119 : vector<16x1xf32> to vector<16x32xf32>
    %121 = arith.mulf %116, %120 : vector<16x32xf32>
    %122 = vector.broadcast %101 : vector<1x32xf32> to vector<16x32xf32>
    %123 = arith.mulf %121, %122 : vector<16x32xf32>
    %124 = vector.broadcast %103 : vector<1x32xf32> to vector<16x32xf32>
    %125 = arith.addf %123, %124 : vector<16x32xf32>
    %c1 = arith.constant 1 : index
    %c0_79 = arith.constant 0 : index
    %c0_80 = arith.constant 0 : index
    %126 = vector.load %arg5[%c1, %c0_79, %c0_80] : memref<2x32x32xf32, #tpu.memory_space<vmem>>, vector<1x32x32xf32>
    %127 = vector.shape_cast %126 : vector<1x32x32xf32> to vector<32x32xf32>
    %cst_81 = arith.constant dense<0.000000e+00> : vector<16x32xf32>
    %128 = tpu.matmul %125, %127, %cst_81 {dimension_numbers = #tpu.dot_dimension_numbers<[1], [0], [0], [1], [0, 0, 1, 1], [], []>} : vector<16x32xf32>, vector<32x32xf32>, vector<16x32xf32> -> vector<16x32xf32>
    %c1_82 = arith.constant 1 : index
    %c0_83 = arith.constant 0 : index
    %c0_84 = arith.constant 0 : index
    %129 = vector.load %arg6[%c1_82, %c0_83, %c0_84] : memref<2x1x32xf32, #tpu.memory_space<vmem>>, vector<1x1x32xf32>
    %130 = vector.shape_cast %129 : vector<1x1x32xf32> to vector<1x32xf32>
    %131 = vector.broadcast %130 : vector<1x32xf32> to vector<16x32xf32>
    %132 = arith.addf %128, %131 : vector<16x32xf32>
    %c1_85 = arith.constant 1 : index
    %c0_86 = arith.constant 0 : index
    %c0_87 = arith.constant 0 : index
    %133 = vector.load %arg7[%c1_85, %c0_86, %c0_87] : memref<2x32x32xf32, #tpu.memory_space<vmem>>, vector<1x32x32xf32>
    %134 = vector.shape_cast %133 : vector<1x32x32xf32> to vector<32x32xf32>
    %cst_88 = arith.constant dense<0.000000e+00> : vector<16x32xf32>
    %135 = tpu.matmul %125, %134, %cst_88 {dimension_numbers = #tpu.dot_dimension_numbers<[1], [0], [0], [1], [0, 0, 1, 1], [], []>} : vector<16x32xf32>, vector<32x32xf32>, vector<16x32xf32> -> vector<16x32xf32>
    %c1_89 = arith.constant 1 : index
    %c0_90 = arith.constant 0 : index
    %c0_91 = arith.constant 0 : index
    %136 = vector.load %arg8[%c1_89, %c0_90, %c0_91] : memref<2x1x32xf32, #tpu.memory_space<vmem>>, vector<1x1x32xf32>
    %137 = vector.shape_cast %136 : vector<1x1x32xf32> to vector<1x32xf32>
    %138 = vector.broadcast %137 : vector<1x32xf32> to vector<16x32xf32>
    %139 = arith.addf %135, %138 : vector<16x32xf32>
    %c1_92 = arith.constant 1 : index
    %c0_93 = arith.constant 0 : index
    %c0_94 = arith.constant 0 : index
    %140 = vector.load %arg9[%c1_92, %c0_93, %c0_94] : memref<2x32x32xf32, #tpu.memory_space<vmem>>, vector<1x32x32xf32>
    %141 = vector.shape_cast %140 : vector<1x32x32xf32> to vector<32x32xf32>
    %cst_95 = arith.constant dense<0.000000e+00> : vector<16x32xf32>
    %142 = tpu.matmul %125, %141, %cst_95 {dimension_numbers = #tpu.dot_dimension_numbers<[1], [0], [0], [1], [0, 0, 1, 1], [], []>} : vector<16x32xf32>, vector<32x32xf32>, vector<16x32xf32> -> vector<16x32xf32>
    %c1_96 = arith.constant 1 : index
    %c0_97 = arith.constant 0 : index
    %c0_98 = arith.constant 0 : index
    %143 = vector.load %arg10[%c1_96, %c0_97, %c0_98] : memref<2x1x32xf32, #tpu.memory_space<vmem>>, vector<1x1x32xf32>
    %144 = vector.shape_cast %143 : vector<1x1x32xf32> to vector<1x32xf32>
    %145 = vector.broadcast %144 : vector<1x32xf32> to vector<16x32xf32>
    %146 = arith.addf %142, %145 : vector<16x32xf32>
    %147 = tpu.concatenate %139, %139, %139, %139 in 0 : vector<16x32xf32>, vector<16x32xf32>, vector<16x32xf32>, vector<16x32xf32> -> vector<64x32xf32>
    %148 = arith.mulf %147, %13 : vector<64x32xf32>
    %149 = tpu.concatenate %146, %146, %146, %146 in 0 : vector<16x32xf32>, vector<16x32xf32>, vector<16x32xf32>, vector<16x32xf32> -> vector<64x32xf32>
    %150 = arith.mulf %149, %13 : vector<64x32xf32>
    %cst_99 = arith.constant dense<0.000000e+00> : vector<16x64xf32>
    %151 = tpu.matmul %132, %148, %cst_99 {dimension_numbers = #tpu.dot_dimension_numbers<[1], [1], [0], [0], [0, 0, 1, 0], [], []>} : vector<16x32xf32>, vector<64x32xf32>, vector<16x64xf32> -> vector<16x64xf32>
    %152 = arith.addf %151, %12 : vector<16x64xf32>
    %cst_100 = arith.constant dense<0xFF800000> : vector<16xf32>
    %153 = vector.multi_reduction <maximumf>, %152, %cst_100 [1] : vector<16x64xf32> to vector<16xf32>
    %154 = vector.shape_cast %153 : vector<16xf32> to vector<16x1xf32>
    %155 = vector.broadcast %154 : vector<16x1xf32> to vector<16x64xf32>
    %156 = arith.subf %152, %155 : vector<16x64xf32>
    %157 = math.exp %156 : vector<16x64xf32>
    %cst_101 = arith.constant dense<0.000000e+00> : vector<16x32xf32>
    %158 = tpu.matmul %157, %150, %cst_101 {dimension_numbers = #tpu.dot_dimension_numbers<[1], [0], [0], [1], [0, 0, 1, 1], [], []>} : vector<16x64xf32>, vector<64x32xf32>, vector<16x32xf32> -> vector<16x32xf32>
    %cst_102 = arith.constant dense<0.000000e+00> : vector<16x32xf32>
    %159 = tpu.matmul %157, %13, %cst_102 {dimension_numbers = #tpu.dot_dimension_numbers<[1], [0], [0], [1], [0, 0, 1, 1], [], []>} : vector<16x64xf32>, vector<64x32xf32>, vector<16x32xf32> -> vector<16x32xf32>
    %160 = arith.divf %158, %159 : vector<16x32xf32>
    %c1_103 = arith.constant 1 : index
    %c0_104 = arith.constant 0 : index
    %c0_105 = arith.constant 0 : index
    %161 = vector.load %arg11[%c1_103, %c0_104, %c0_105] : memref<2x32x32xf32, #tpu.memory_space<vmem>>, vector<1x32x32xf32>
    %162 = vector.shape_cast %161 : vector<1x32x32xf32> to vector<32x32xf32>
    %cst_106 = arith.constant dense<0.000000e+00> : vector<16x32xf32>
    %163 = tpu.matmul %160, %162, %cst_106 {dimension_numbers = #tpu.dot_dimension_numbers<[1], [0], [0], [1], [0, 0, 1, 1], [], []>} : vector<16x32xf32>, vector<32x32xf32>, vector<16x32xf32> -> vector<16x32xf32>
    %c1_107 = arith.constant 1 : index
    %c0_108 = arith.constant 0 : index
    %c0_109 = arith.constant 0 : index
    %164 = vector.load %arg12[%c1_107, %c0_108, %c0_109] : memref<2x1x32xf32, #tpu.memory_space<vmem>>, vector<1x1x32xf32>
    %165 = vector.shape_cast %164 : vector<1x1x32xf32> to vector<1x32xf32>
    %166 = vector.broadcast %165 : vector<1x32xf32> to vector<16x32xf32>
    %167 = arith.addf %163, %166 : vector<16x32xf32>
    %168 = arith.addf %125, %167 : vector<16x32xf32>
    %c1_110 = arith.constant 1 : index
    %c0_111 = arith.constant 0 : index
    %c0_112 = arith.constant 0 : index
    %169 = vector.load %arg13[%c1_110, %c0_111, %c0_112] : memref<2x1x32xf32, #tpu.memory_space<vmem>>, vector<1x1x32xf32>
    %170 = vector.shape_cast %169 : vector<1x1x32xf32> to vector<1x32xf32>
    %c1_113 = arith.constant 1 : index
    %c0_114 = arith.constant 0 : index
    %c0_115 = arith.constant 0 : index
    %171 = vector.load %arg14[%c1_113, %c0_114, %c0_115] : memref<2x1x32xf32, #tpu.memory_space<vmem>>, vector<1x1x32xf32>
    %172 = vector.shape_cast %171 : vector<1x1x32xf32> to vector<1x32xf32>
    %cst_116 = arith.constant dense<0.000000e+00> : vector<16xf32>
    %173 = vector.multi_reduction <add>, %168, %cst_116 [1] : vector<16x32xf32> to vector<16xf32>
    %174 = vector.shape_cast %173 : vector<16xf32> to vector<16x1xf32>
    %cst_117 = arith.constant 3.200000e+01 : f32
    %175 = vector.broadcast %cst_117 : f32 to vector<16x1xf32>
    %176 = arith.divf %174, %175 : vector<16x1xf32>
    %177 = vector.broadcast %176 : vector<16x1xf32> to vector<16x32xf32>
    %178 = arith.subf %168, %177 : vector<16x32xf32>
    %179 = arith.mulf %178, %178 : vector<16x32xf32>
    %cst_118 = arith.constant dense<0.000000e+00> : vector<16xf32>
    %180 = vector.multi_reduction <add>, %179, %cst_118 [1] : vector<16x32xf32> to vector<16xf32>
    %181 = vector.shape_cast %180 : vector<16xf32> to vector<16x1xf32>
    %cst_119 = arith.constant 3.200000e+01 : f32
    %182 = vector.broadcast %cst_119 : f32 to vector<16x1xf32>
    %183 = arith.divf %181, %182 : vector<16x1xf32>
    %184 = vector.broadcast %176 : vector<16x1xf32> to vector<16x32xf32>
    %185 = arith.subf %168, %184 : vector<16x32xf32>
    %cst_120 = arith.constant 9.99999974E-6 : f32
    %186 = vector.broadcast %cst_120 : f32 to vector<16x1xf32>
    %187 = arith.addf %183, %186 : vector<16x1xf32>
    %188 = math.rsqrt %187 : vector<16x1xf32>
    %189 = vector.broadcast %188 : vector<16x1xf32> to vector<16x32xf32>
    %190 = arith.mulf %185, %189 : vector<16x32xf32>
    %191 = vector.broadcast %170 : vector<1x32xf32> to vector<16x32xf32>
    %192 = arith.mulf %190, %191 : vector<16x32xf32>
    %193 = vector.broadcast %172 : vector<1x32xf32> to vector<16x32xf32>
    %194 = arith.addf %192, %193 : vector<16x32xf32>
    %c1_121 = arith.constant 1 : index
    %c0_122 = arith.constant 0 : index
    %c0_123 = arith.constant 0 : index
    %195 = vector.load %arg17[%c1_121, %c0_122, %c0_123] : memref<2x32x64xf32, #tpu.memory_space<vmem>>, vector<1x32x64xf32>
    %196 = vector.shape_cast %195 : vector<1x32x64xf32> to vector<32x64xf32>
    %cst_124 = arith.constant dense<0.000000e+00> : vector<16x64xf32>
    %197 = tpu.matmul %194, %196, %cst_124 {dimension_numbers = #tpu.dot_dimension_numbers<[1], [0], [0], [1], [0, 0, 1, 1], [], []>} : vector<16x32xf32>, vector<32x64xf32>, vector<16x64xf32> -> vector<16x64xf32>
    %c1_125 = arith.constant 1 : index
    %c0_126 = arith.constant 0 : index
    %c0_127 = arith.constant 0 : index
    %198 = vector.load %arg18[%c1_125, %c0_126, %c0_127] : memref<2x1x64xf32, #tpu.memory_space<vmem>>, vector<1x1x64xf32>
    %199 = vector.shape_cast %198 : vector<1x1x64xf32> to vector<1x64xf32>
    %200 = vector.broadcast %199 : vector<1x64xf32> to vector<16x64xf32>
    %201 = arith.addf %197, %200 : vector<16x64xf32>
    %cst_128 = arith.constant 0.000000e+00 : f32
    %202 = vector.broadcast %cst_128 : f32 to vector<16x64xf32>
    %203 = arith.maximumf %201, %202 : vector<16x64xf32>
    %c1_129 = arith.constant 1 : index
    %c0_130 = arith.constant 0 : index
    %c0_131 = arith.constant 0 : index
    %204 = vector.load %arg19[%c1_129, %c0_130, %c0_131] : memref<2x64x32xf32, #tpu.memory_space<vmem>>, vector<1x64x32xf32>
    %205 = vector.shape_cast %204 : vector<1x64x32xf32> to vector<64x32xf32>
    %cst_132 = arith.constant dense<0.000000e+00> : vector<16x32xf32>
    %206 = tpu.matmul %203, %205, %cst_132 {dimension_numbers = #tpu.dot_dimension_numbers<[1], [0], [0], [1], [0, 0, 1, 1], [], []>} : vector<16x64xf32>, vector<64x32xf32>, vector<16x32xf32> -> vector<16x32xf32>
    %c1_133 = arith.constant 1 : index
    %c0_134 = arith.constant 0 : index
    %c0_135 = arith.constant 0 : index
    %207 = vector.load %arg20[%c1_133, %c0_134, %c0_135] : memref<2x1x32xf32, #tpu.memory_space<vmem>>, vector<1x1x32xf32>
    %208 = vector.shape_cast %207 : vector<1x1x32xf32> to vector<1x32xf32>
    %209 = vector.broadcast %208 : vector<1x32xf32> to vector<16x32xf32>
    %210 = arith.addf %206, %209 : vector<16x32xf32>
    %211 = arith.addf %194, %210 : vector<16x32xf32>
    %c1_136 = arith.constant 1 : index
    %c0_137 = arith.constant 0 : index
    %c0_138 = arith.constant 0 : index
    %212 = vector.load %arg15[%c1_136, %c0_137, %c0_138] : memref<2x1x32xf32, #tpu.memory_space<vmem>>, vector<1x1x32xf32>
    %213 = vector.shape_cast %212 : vector<1x1x32xf32> to vector<1x32xf32>
    %c1_139 = arith.constant 1 : index
    %c0_140 = arith.constant 0 : index
    %c0_141 = arith.constant 0 : index
    %214 = vector.load %arg16[%c1_139, %c0_140, %c0_141] : memref<2x1x32xf32, #tpu.memory_space<vmem>>, vector<1x1x32xf32>
    %215 = vector.shape_cast %214 : vector<1x1x32xf32> to vector<1x32xf32>
    %cst_142 = arith.constant dense<0.000000e+00> : vector<16xf32>
    %216 = vector.multi_reduction <add>, %211, %cst_142 [1] : vector<16x32xf32> to vector<16xf32>
    %217 = vector.shape_cast %216 : vector<16xf32> to vector<16x1xf32>
    %cst_143 = arith.constant 3.200000e+01 : f32
    %218 = vector.broadcast %cst_143 : f32 to vector<16x1xf32>
    %219 = arith.divf %217, %218 : vector<16x1xf32>
    %220 = vector.broadcast %219 : vector<16x1xf32> to vector<16x32xf32>
    %221 = arith.subf %211, %220 : vector<16x32xf32>
    %222 = arith.mulf %221, %221 : vector<16x32xf32>
    %cst_144 = arith.constant dense<0.000000e+00> : vector<16xf32>
    %223 = vector.multi_reduction <add>, %222, %cst_144 [1] : vector<16x32xf32> to vector<16xf32>
    %224 = vector.shape_cast %223 : vector<16xf32> to vector<16x1xf32>
    %cst_145 = arith.constant 3.200000e+01 : f32
    %225 = vector.broadcast %cst_145 : f32 to vector<16x1xf32>
    %226 = arith.divf %224, %225 : vector<16x1xf32>
    %227 = vector.broadcast %219 : vector<16x1xf32> to vector<16x32xf32>
    %228 = arith.subf %211, %227 : vector<16x32xf32>
    %cst_146 = arith.constant 9.99999974E-6 : f32
    %229 = vector.broadcast %cst_146 : f32 to vector<16x1xf32>
    %230 = arith.addf %226, %229 : vector<16x1xf32>
    %231 = math.rsqrt %230 : vector<16x1xf32>
    %232 = vector.broadcast %231 : vector<16x1xf32> to vector<16x32xf32>
    %233 = arith.mulf %228, %232 : vector<16x32xf32>
    %234 = vector.broadcast %213 : vector<1x32xf32> to vector<16x32xf32>
    %235 = arith.mulf %233, %234 : vector<16x32xf32>
    %236 = vector.broadcast %215 : vector<1x32xf32> to vector<16x32xf32>
    %237 = arith.addf %235, %236 : vector<16x32xf32>
    %c0_147 = arith.constant 0 : index
    %c0_148 = arith.constant 0 : index
    %238 = vector.load %arg21[%c0_147, %c0_148] : memref<32x128xf32, #tpu.memory_space<vmem>>, vector<32x128xf32>
    %cst_149 = arith.constant dense<0.000000e+00> : vector<16x128xf32>
    %239 = tpu.matmul %237, %238, %cst_149 {dimension_numbers = #tpu.dot_dimension_numbers<[1], [0], [0], [1], [0, 0, 1, 1], [], []>} : vector<16x32xf32>, vector<32x128xf32>, vector<16x128xf32> -> vector<16x128xf32>
    %c0_150 = arith.constant 0 : index
    %c0_151 = arith.constant 0 : index
    %240 = vector.load %arg22[%c0_150, %c0_151] : memref<1x128xf32, #tpu.memory_space<vmem>>, vector<1x128xf32>
    %241 = vector.broadcast %240 : vector<1x128xf32> to vector<16x128xf32>
    %242 = arith.addf %239, %241 : vector<16x128xf32>
    %c0_152 = arith.constant 0 : index
    %c0_153 = arith.constant 0 : index
    %243 = vector.load %arg23[%c0_152, %c0_153] : memref<16x128xf32, #tpu.memory_space<vmem>>, vector<16x128xf32>
    tpu.vector_store %arg23[%c0_152, %c0_153], %242 {strides = array<i32>} : memref<16x128xf32, #tpu.memory_space<vmem>>, vector<16x128xf32>,
    return
  }
}

</mosaic_0001>

<bundles_post_ra>
// kernel: transformer_forward.1
= control target key start
LH: loop header
LB: loop body
LE: loop exit
PB: predicated region body
PF: predicated region fallthrough
CT: control target
= control target key end

     0   :  { %s2446_s0 = inlined_call_operand.vmem [shape: s32[16,1], index: 0, kind: input, shape index: {}]   ;;  %s2447_s1 = inlined_call_operand.vmem [shape: f32[16,32], index: 1, kind: input, shape index: {}]   ;;  %s2448_s2 = inlined_call_operand.hbm [shape: f32[16,64], index: 2, kind: input, shape index: {}]   ;;  %s2449_s3 = inlined_call_operand.vmem [shape: f32[64,32], index: 3, kind: input, shape index: {}]   ;;  %s2450_s4 = inlined_call_operand.vmem [shape: f32[40,32], index: 4, kind: input, shape index: {}]   ;;  %s2451_s5 = inlined_call_operand.vmem [shape: f32[2,32,32], index: 5, kind: input, shape index: {}]   ;;  %s2452_s6 = inlined_call_operand.vmem [shape: f32[2,1,32], index: 6, kind: input, shape index: {}]   ;;  %s2453_s7 = inlined_call_operand.vmem [shape: f32[2,32,32], index: 7, kind: input, shape index: {}]   ;;  %s2454_s8 = inlined_call_operand.vmem [shape: f32[2,1,32], index: 8, kind: input, shape index: {}]   ;;  %s2455_s9 = inlined_call_operand.vmem [shape: f32[2,32,32], index: 9, kind: input, shape index: {}]   ;;  %s2456_s10 = inlined_call_operand.vmem [shape: f32[2,1,32], index: 10, kind: input, shape index: {}]   ;;  %s2457_s11 = inlined_call_operand.vmem [shape: f32[2,32,32], index: 11, kind: input, shape index: {}]   ;;  %s2458_s12 = inlined_call_operand.vmem [shape: f32[2,1,32], index: 12, kind: input, shape index: {}]   ;;  %s2459_s13 = inlined_call_operand.hbm [shape: f32[2,1,32], index: 13, kind: input, shape index: {}]   ;;  %s2460_s14 = inlined_call_operand.hbm [shape: f32[2,1,32], index: 14, kind: input, shape index: {}]   ;;  %s2461_s15 = inlined_call_operand.hbm [shape: f32[2,1,32], index: 15, kind: input, shape index: {}]   ;;  %s2462_s16 = inlined_call_operand.hbm [shape: f32[2,1,32], index: 16, kind: input, shape index: {}]   ;;  %s2463_s17 = inlined_call_operand.hbm [shape: f32[2,32,64], index: 17, kind: input, shape index: {}]   ;;  %s2464_s18 = inlined_call_operand.hbm [shape: f32[2,1,64], index: 18, kind: input, shape index: {}]   ;;  %s2465_s19 = inlined_call_operand.vmem [shape: f32[2,64,32], index: 19, kind: input, shape index: {}]   ;;  %s2466_s20 = inlined_call_operand.hbm [shape: f32[2,1,32], index: 20, kind: input, shape index: {}]   ;;  %s2467_s21 = inlined_call_operand.hbm [shape: f32[32,128], index: 21, kind: input, shape index: {}]   ;;  %s2468_s22 = inlined_call_operand.hbm [shape: f32[1,128], index: 22, kind: input, shape index: {}]   ;;  %s2469_s23 = inlined_call_operand.hbm [shape: f32[16,128], index: 23, kind: output, shape index: {}]  }
   0x1   :  { %2477 = sst [smem:[#allocation27_spill]] %s2446_s0 }
   0x2   :  { %2478 = sst [smem:[#allocation28_spill]] %s2447_s1 }
   0x3   :  { %2479 = sst [smem:[#allocation29_spill]] %s2448_s2 }
   0x4   :  { %2480 = sst [smem:[#allocation30_spill]] %s2449_s3 }
   0x5   :  { %2481 = sst [smem:[#allocation31_spill]] %s2450_s4 }
   0x6   :  { %2482 = sst [smem:[#allocation32_spill]] %s2451_s5 }
   0x7   :  { %2483 = sst [smem:[#allocation33_spill]] %s2452_s6 }
   0x8   :  { %2484 = sst [smem:[#allocation34_spill]] %s2453_s7 }
   0x9   :  { %28 = vsyncpa [#allocation3], 0 }
   0xa   :  { %29 = vsyncpa [#allocation6], 0 }
   0xb   :  { %30 = vsyncpa [#allocation9], 0 }
   0xc   :  { %31 = vsyncpa [#allocation12], 0 }
   0xd   :  { %32 = vsyncpa [#allocation15], 0 }
   0xe   :  { %33 = vsyncpa [#allocation18], 0  ;;  %s76_s24 = sshll.u32 %s2459_s13, 4  ;;  %s77_s24 = int_to_ptr.hbm [resolvable:$true] %s76_s24 }
   0xf   :  { %34 = vsyncpa [#allocation4], 0  ;;  %s1828_s25 = smov [#allocation5]   ;;  %s102_s2 = sshll.u32 %s2461_s15, 4  ;;  %s103_s2 = int_to_ptr.hbm [resolvable:$true] %s102_s2 }
  0x10   :  { %s78_s5 = sshll.u32 %s1828_s25, 4  ;;  %s1829_s6 = smov 16   ;;  %s79_s5 = int_to_ptr.vmem [resolvable:$true] %s78_s5 }
  0x11   :  { %s1830_s27 = smov 1   ;;  %s1831_s7 = smov [#allocation8]  }
  0x12   :  { %84 = dma.hbm_to_vmem [thread:$0]  %s77_s24, 32, %s79_s5, [#allocation6], %s1829_s6, %s1829_s6, %s1830_s27  }
  0x13   :  { %s104_s28 = sshll.u32 %s1831_s7, 4  ;;  %s128_s3 = sshll.u32 %s2463_s17, 4  ;;  %s105_s28 = int_to_ptr.vmem [resolvable:$true] %s104_s28  ;;  %s129_s3 = int_to_ptr.hbm [resolvable:$true] %s128_s3 }
  0x14   :  { %110 = dma.hbm_to_vmem [thread:$0]  %s103_s2, 32, %s105_s28, [#allocation9], %s1829_s6, %s1829_s6, %s1830_s27  }
  0x15   :  { %s1832_s15 = smov [#allocation11]   ;;  %s156_s24 = sshll.u32 %s2466_s20, 4  ;;  %s157_s24 = int_to_ptr.hbm [resolvable:$true] %s156_s24 }
  0x16   :  { %s130_s0 = sshll.u32 %s1832_s15, 4  ;;  %s1833_s25 = smov 128   ;;  %s131_s0 = int_to_ptr.vmem [resolvable:$true] %s130_s0 }
  0x17   :  { %s1834_s5 = smov 8   ;;  %s1835_s1 = smov [#allocation14]  }
  0x18   :  { %136 = dma.hbm_to_vmem [thread:$0]  %s129_s3, 1024, %s131_s0, [#allocation12], %s1833_s25, %s1833_s25, %s1834_s5  }
  0x19   :  { %s158_s26 = sshll.u32 %s1835_s1, 4  ;;  %s2485_s17 = sld [smem:[#allocation29_spill]]  ;;  %s159_s26 = int_to_ptr.vmem [resolvable:$true] %s158_s26 }
  0x1a   :  { %164 = dma.hbm_to_vmem [thread:$0]  %s157_s24, 32, %s159_s26, [#allocation15], %s1829_s6, %s1829_s6, %s1830_s27  }
  0x1b   :  { %s89_s29 = sshll.u32 %s2460_s14, 4  ;;  %s1836_s15 = smov [#allocation2]   ;;  %s90_s29 = int_to_ptr.hbm [resolvable:$true] %s89_s29 }
  0x1c   :  { %s45_s4 = sshll.u32 %s1836_s15, 4  ;;  %s1837_s3 = smov [#allocation7]   ;;  %s46_s4 = int_to_ptr.vmem [resolvable:$true] %s45_s4 }
  0x1d   :  { %s91_s0 = sshll.u32 %s1837_s3, 4  ;;  %s115_s2 = sshll.u32 %s2462_s16, 4  ;;  %s92_s0 = int_to_ptr.vmem [resolvable:$true] %s91_s0  ;;  %s116_s2 = int_to_ptr.hbm [resolvable:$true] %s115_s2 }
  0x1e   :  { %97 = dma.hbm_to_vmem [thread:$0]  %s90_s29, 32, %s92_s0, [#allocation6], %s1829_s6, %s1829_s6, %s1830_s27  }
  0x1f   :  { %s43_s28 = sshll.u32 %s2485_s17, 4  ;;  %s141_s26 = sshll.u32 %s2464_s18, 4  ;;  %s44_s28 = int_to_ptr.hbm [resolvable:$true] %s43_s28  ;;  %s142_s26 = int_to_ptr.hbm [resolvable:$true] %s141_s26 }
  0x20   :  { %51 = dma.hbm_to_vmem [thread:$0]  %s44_s28, 256, %s46_s4, [#allocation3], %s1833_s25, %s1833_s25, %s1834_s5  }
  0x21   :  { %s1838_s7 = smov [#allocation10]   ;;  %s1839_s28 = smov [#allocation13]  }
  0x22   :  { %s117_s17 = sshll.u32 %s1838_s7, 4  ;;  %s143_s16 = sshll.u32 %s1839_s28, 4  ;;  %s118_s17 = int_to_ptr.vmem [resolvable:$true] %s117_s17  ;;  %s144_s16 = int_to_ptr.vmem [resolvable:$true] %s143_s16 }
  0x23   :  { %123 = dma.hbm_to_vmem [thread:$0]  %s116_s2, 32, %s118_s17, [#allocation9], %s1829_s6, %s1829_s6, %s1830_s27  }
  0x24   :  { %s169_s15 = sshll.u32 %s2467_s21, 4  ;;  %s183_s4 = sshll.u32 %s2468_s22, 4  ;;  %s170_s15 = int_to_ptr.hbm [resolvable:$true] %s169_s15  ;;  %s184_s4 = int_to_ptr.hbm [resolvable:$true] %s183_s4 }
  0x25   :  { %149 = dma.hbm_to_vmem [thread:$0]  %s142_s26, 32, %s144_s16, [#allocation12], %s1829_s6, %s1829_s6, %s1830_s27  }
  0x26   :  { %s1840_s3 = smov [#allocation16]   ;;  %s1841_s30 = smov [#allocation17]  }
  0x27   :  { %s171_s0 = sshll.u32 %s1840_s3, 4  ;;  %s185_s21 = sshll.u32 %s1841_s30, 4  ;;  %s172_s0 = int_to_ptr.vmem [resolvable:$true] %s171_s0  ;;  %s186_s21 = int_to_ptr.vmem [resolvable:$true] %s185_s21 }
  0x28   :  { %177 = dma.hbm_to_vmem [thread:$0]  %s170_s15, 512, %s172_s0, [#allocation15], %s1833_s25, %s1833_s25, %s1834_s5  }
  0x29   :  { %188 = dma.hbm_to_vmem [thread:$0]  %s184_s4, 16, %s186_s21, [#allocation18]  }
  0x2a   :  { %1814 = dma.done.wait [#allocation3], 256  }
  0x2b   :  { %1815 = vsyncadd [#allocation3], 4294967040 }
  0x2c   :  { %1816 = dma.done.wait [#allocation6], 64  }
  0x2d   :  { %1817 = vsyncadd [#allocation6], 4294967232 }
  0x2e   :  { %1818 = dma.done.wait [#allocation9], 64  }
  0x2f   :  { %1819 = vsyncadd [#allocation9], 4294967232 }
  0x30   :  { %1820 = dma.done.wait [#allocation12], 1056  }
  0x31   :  { %1821 = vsyncadd [#allocation12], 4294966240 }
  0x32   :  { %1822 = dma.done.wait [#allocation15], 544  }
  0x33   :  { %1823 = vsyncadd [#allocation15], 4294966752 }
  0x34   :  { %1824 = dma.done.wait [#allocation18], 16  }
  0x35   :  { %1825 = vsyncadd [#allocation18], 4294967280  ;;  %v1842_v0 = vmov 0   ;;  %s2486_s27 = sld [smem:[#allocation27_spill]]  ;;  %v368_v10 = vld [vmem:[%s2455_s9 + $0x18] sm:$0xff]  ;;  %v231_v11 = vlaneseq  ;;  %vm250_vm0 = vcmask 326656  }
  0x36   :  { %1494 = vset.pattern.permute.xlu0 %v1842_v0  ;;  %s2487_s14 = sld [smem:[#allocation31_spill]]  ;;  %385 = vmatpush.msra.mxu3 %v368_v10  ;;  %v1843_v14 = vmov 0.0   ;;  %v367_v20 = vld [vmem:[%s2455_s9 + $0x10] sm:$0xff]  ;;  %v366_v23 = vld [vmem:[%s2455_s9 + $0x8] sm:$0xff]  ;;  %v365_v26 = vld [vmem:[%s2455_s9] sm:$0xff]  ;;  %vm304_vm3 = vcmask 261120  }
  0x37   :  { %s2488_s3 = sld [smem:[#allocation32_spill]]  ;;  %v232_v12 = vand.u32 127, %v231_v11  ;;  %v1497_v45 = vld [vmem:[%s2456_s10] ss:$0 sm:$0xff]  ;;  %vm465_vm4 = vcmask 523264   ;;  %s1356_s1 = sshll.u32 %s2469_s23, 4  ;;  %s1357_s1 = int_to_ptr.hbm [resolvable:$true] %s1356_s1 }
  0x38   :  { %s2489_s21 = sld [smem:[#allocation34_spill]]  ;;  %386 = vmatpush.msra.mxu3 %v367_v20  ;;  %v1496_v46 = vld [vmem:[%s2454_s8] ss:$0 sm:$0xff] }
  0x39   :  { %s2491_s26 = sld [smem:[#allocation30_spill]]  ;;  %v2185_v10 = vld [vmem:[#allocation2] sm:$0xff] }
  0x3a   :  { %387 = vmatpush.msra.mxu3 %v366_v23  ;;  %s2492_s7 = sld [smem:[#allocation33_spill]] }
  0x3b   :  { %v229_v1 = vld [vmem:[%s2486_s27] sm:$0xff]  ;;  %v230_v6 = vld [vmem:[%s2486_s27 + $0x8] sm:$0xff]  ;;  %s2490_s27 = sld [smem:[#allocation28_spill]] }
  0x3c   :  { %v249_v2 = vld [vmem:[%s2487_s14 + $0x20] sm:$0xff]  ;;  %234 = vperm.xlu0 %1494, %v229_v1   ;;  %v248_v3 = vld [vmem:[%s2487_s14 + $0x18] sm:$0xff]  ;;  %v247_v4 = vld [vmem:[%s2487_s14 + $0x10] sm:$0xff]  ;;  %388 = vmatpush.msra.mxu3 %v365_v26 }
  0x3d   :  { %268 = vmatpush.msra.mxu0 %v249_v2  ;;  %v246_v5 = vld [vmem:[%s2487_s14 + $0x8] sm:$0xff]  ;;  %v245_v7 = vld [vmem:[%s2487_s14] sm:$0xff]  ;;  %v299_v8 = vld [vmem:[%s2488_s3 + $0x18] sm:$0xff] }
  0x3e   :  { %v337_v9 = vld [vmem:[%s2489_s21 + $0x18] sm:$0xff]  ;;  %323 = vmatpush.msra.mxu1 %v299_v8  ;;  %v298_v18 = vld [vmem:[%s2488_s3 + $0x10] sm:$0xff]  ;;  %v297_v21 = vld [vmem:[%s2488_s3 + $0x8] sm:$0xff] }
  0x3f   :  { %269 = vmatpush.msra.mxu0 %v248_v3  ;;  %354 = vmatpush.msra.mxu2 %v337_v9  ;;  %v336_v19 = vld [vmem:[%s2489_s21 + $0x10] sm:$0xff]  ;;  %v335_v22 = vld [vmem:[%s2489_s21 + $0x8] sm:$0xff]  ;;  %v296_v24 = vld [vmem:[%s2488_s3] sm:$0xff] }
  0x40   :  { %324 = vmatpush.msra.mxu1 %v298_v18  ;;  %v334_v25 = vld [vmem:[%s2489_s21] sm:$0xff]  ;;  %v2105_v35 = vld [vmem:[%s2491_s26 + $0x38] sm:$0xff]  ;;  %v2111_v36 = vld [vmem:[%s2491_s26 + $0x30] sm:$0xff] }
  0x41   :  { %270 = vmatpush.msra.mxu0 %v247_v4  ;;  %355 = vmatpush.msra.mxu2 %v336_v19  ;;  %v282_v28 = vld [vmem:[%s2490_s27] sm:$0xff]  ;;  %v283_v32 = vld [vmem:[%s2490_s27 + $0x8] sm:$0xff]  ;;  %v2129_v39 = vld [vmem:[%s2491_s26 + $0x18] sm:$0xff] }
  0x42   :  { %325 = vmatpush.msra.mxu1 %v297_v21  ;;  %515 = vmatpush.msrb.mxu3 %v2105_v35  ;;  %v2117_v37 = vld [vmem:[%s2491_s26 + $0x28] sm:$0xff]  ;;  %v2123_v38 = vld [vmem:[%s2491_s26 + $0x20] sm:$0xff]  ;;  %v2135_v40 = vld [vmem:[%s2491_s26 + $0x10] sm:$0xff] }
  0x43   :  { %271 = vmatpush.msra.mxu0 %v246_v5  ;;  %356 = vmatpush.msra.mxu2 %v335_v22  ;;  %v2141_v41 = vld [vmem:[%s2491_s26 + $0x8] sm:$0xff]  ;;  %v2147_v42 = vld [vmem:[%s2491_s26] sm:$0xff]  ;;  %v563_v26 = vld [vmem:[%s2457_s11 + $0x18] sm:$0xff] }
  0x44   :  { %237 = vperm.xlu0 %1494, %v230_v6   ;;  %326 = vmatpush.msra.mxu1 %v296_v24  ;;  %v1495_v5 = vld [vmem:[%s2492_s7] ss:$0 sm:$0xff] }
  0x45   :  { %272 = vmatpush.msra.mxu0 %v245_v7  ;;  %357 = vmatpush.msra.mxu2 %v334_v25 }
  0x46   :  { %516 = vmatpush.msrb.mxu3 %v2111_v36 }
  0x48   :  { %517 = vmatpush.msrb.mxu3 %v2117_v37 }
  0x4a   :  { %518 = vmatpush.msrb.mxu3 %v2123_v38 }
  0x4c   :  { %519 = vmatpush.msrb.mxu3 %v2129_v39 }
  0x4e   :  { %520 = vmatpush.msrb.mxu3 %v2135_v40 }
  0x50   :  { %521 = vmatpush.msrb.mxu3 %v2141_v41 }
  0x52   :  { %522 = vmatpush.msrb.mxu3 %v2147_v42 }
  0xae   :  { %v235_v13 = vpop.permute.xlu0 %234 }
  0xaf   :  { %vm239_vm1 = vcmp.eq.s32.totalorder %v235_v13, %v232_v12 }
  0xb0   :  { %v1374_v15 = vsel %vm239_vm1, 1.0, %v1843_v14 }
  0xb1   :  { %1376 = vmatmul.msk.f32.vlgmr.msra.gmra.mxu0 %vm250_vm0, %v1374_v15 }
  0xb6   :  { %v238_v16 = vpop.permute.xlu0 %237 }
  0xb7   :  { %vm240_vm2 = vcmp.eq.s32.totalorder %v238_v16, %v232_v12 }
  0xb8   :  { %v1375_v17 = vsel %vm240_vm2, 1.0, %v1843_v14  ;;  %v2189_v14 = vld [vmem:[#allocation2 + $0x8] sm:$0xff] }
  0xb9   :  { %1377 = vmatmul.msk.f32.gmra.mxu0 %vm250_vm0, %v1375_v17 }
 0x12e   :  { %v274_v27 = vpop.f32.mrf.mxu0 }
 0x12f   :  { %v280_v29 = vmul.f32 5.656854, %v274_v27  ;;  %v562_v27 = vld [vmem:[%s2457_s11 + $0x10] sm:$0xff] }
 0x131   :  { %v2083_v30 = vadd.f32 %v282_v28, %v280_v29  ;;  %v561_v28 = vld [vmem:[%s2457_s11 + $0x8] sm:$0xff]  ;;  %v560_v29 = vld [vmem:[%s2457_s11] sm:$0xff] }
 0x133   :  { %1378 = vmatmul.msk.f32.vlgmr.msra.gmra.mxu1 %vm304_vm3, %v2083_v30  ;;  %1380 = vmatmul.msk.f32.vlgmr.msra.gmra.mxu2 %vm304_vm3, %v2083_v30 }
 0x134   :  { %1382 = vmatmul.msk.f32.vlgmr.msra.gmra.mxu3 %vm304_vm3, %v2083_v30 }
 0x136   :  { %v277_v31 = vpop.f32.mrf.mxu0 }
 0x137   :  { %v281_v33 = vmul.f32 5.656854, %v277_v31 }
 0x139   :  { %v2094_v34 = vadd.f32 %v283_v32, %v281_v33 }
 0x13b   :  { %1379 = vmatmul.msk.f32.gmra.mxu1 %vm304_vm3, %v2094_v34  ;;  %1381 = vmatmul.msk.f32.gmra.mxu2 %vm304_vm3, %v2094_v34 }
 0x13c   :  { %1383 = vmatmul.msk.f32.gmra.mxu3 %vm304_vm3, %v2094_v34 }
 0x1b0   :  { %v328_v4 = vpop.f32.mrf.mxu1 }
 0x1b1   :  { %v329_v7 = vadd.f32 %v1495_v5, %v328_v4 }
 0x1b6   :  { %v359_v43 = vpop.f32.mrf.mxu2 }
 0x1b7   :  { %v390_v44 = vpop.f32.mrf.mxu3  ;;  %v360_v52 = vadd.f32 %v1496_v46, %v359_v43 }
 0x1b8   :  { %v391_v50 = vadd.f32 %v1497_v45, %v390_v44  ;;  %v331_v8 = vpop.f32.mrf.mxu1 }
 0x1b9   :  { %v402_v56 = vmul.f32 %v360_v52, %v2111_v36  ;;  %v400_v62 = vmul.f32 %v360_v52, %v2123_v38  ;;  %v398_v2 = vmul.f32 %v360_v52, %v2135_v40  ;;  %v396_v6 = vmul.f32 %v360_v52, %v2147_v42 }
 0x1ba   :  { %v410_v55 = vmul.f32 %v391_v50, %v2111_v36  ;;  %v408_v58 = vmul.f32 %v391_v50, %v2123_v38  ;;  %v406_v61 = vmul.f32 %v391_v50, %v2135_v40  ;;  %v404_v0 = vmul.f32 %v391_v50, %v2147_v42 }
 0x1bb   :  { %v332_v9 = vadd.f32 %v1495_v5, %v331_v8 }
 0x1be   :  { %v362_v47 = vpop.f32.mrf.mxu2 }
 0x1bf   :  { %v363_v48 = vadd.f32 %v1496_v46, %v362_v47  ;;  %v393_v49 = vpop.f32.mrf.mxu3 }
 0x1c0   :  { %v394_v51 = vadd.f32 %v1497_v45, %v393_v49 }
 0x1c1   :  { %v403_v53 = vmul.f32 %v363_v48, %v2105_v35  ;;  %v401_v59 = vmul.f32 %v363_v48, %v2117_v37  ;;  %v399_v1 = vmul.f32 %v363_v48, %v2129_v39  ;;  %v397_v3 = vmul.f32 %v363_v48, %v2141_v41 }
 0x1c2   :  { %v411_v54 = vmul.f32 %v394_v51, %v2105_v35  ;;  %v409_v57 = vmul.f32 %v394_v51, %v2117_v37  ;;  %v407_v60 = vmul.f32 %v394_v51, %v2129_v39  ;;  %v405_v63 = vmul.f32 %v394_v51, %v2141_v41 }
 0x1c3   :  { %1384 = vmatpush.xpose.msk.msrb.mxu1 %vm304_vm3, %v403_v53 }
 0x1c4   :  { %492 = vmatpush.msrb.mxu0 %v411_v54  ;;  %1460 = vmatpush.msrb.mxu2 %v411_v54 }
 0x1c6   :  { %493 = vmatpush.msrb.mxu0 %v410_v55  ;;  %1461 = vmatpush.msrb.mxu2 %v410_v55 }
 0x1c7   :  { %1385 = vmatpush.xpose.msk.msrb.mxu1 %vm304_vm3, %v402_v56 }
 0x1c8   :  { %494 = vmatpush.msrb.mxu0 %v409_v57  ;;  %1462 = vmatpush.msrb.mxu2 %v409_v57 }
 0x1ca   :  { %495 = vmatpush.msrb.mxu0 %v408_v58  ;;  %1463 = vmatpush.msrb.mxu2 %v408_v58 }
 0x1cb   :  { %1386 = vmatpush.xpose.msk.msrb.mxu1 %vm304_vm3, %v401_v59 }
 0x1cc   :  { %496 = vmatpush.msrb.mxu0 %v407_v60  ;;  %1464 = vmatpush.msrb.mxu2 %v407_v60 }
 0x1ce   :  { %497 = vmatpush.msrb.mxu0 %v406_v61  ;;  %1465 = vmatpush.msrb.mxu2 %v406_v61 }
 0x1cf   :  { %1387 = vmatpush.xpose.msk.msrb.mxu1 %vm304_vm3, %v400_v62 }
 0x1d0   :  { %498 = vmatpush.msrb.mxu0 %v405_v63  ;;  %1466 = vmatpush.msrb.mxu2 %v405_v63 }
 0x1d2   :  { %499 = vmatpush.msrb.mxu0 %v404_v0  ;;  %1467 = vmatpush.msrb.mxu2 %v404_v0 }
 0x1d3   :  { %1388 = vmatpush.xpose.msk.msrb.mxu1 %vm304_vm3, %v399_v1 }
 0x1d4   :  { %586 = vmatpush.msra.mxu0 %v563_v26 }
 0x1d6   :  { %587 = vmatpush.msra.mxu0 %v562_v27 }
 0x1d7   :  { %1389 = vmatpush.xpose.msk.msrb.mxu1 %vm304_vm3, %v398_v2  ;;  %v1498_v2 = vld [vmem:[%s2458_s12] ss:$0 sm:$0xff] }
 0x1d8   :  { %588 = vmatpush.msra.mxu0 %v561_v28  ;;  %v665_v28 = vld [vmem:[#allocation11 + $0x18] sm:$0xff] }
 0x1d9   :  { %688 = vmatpush.msra.mxu2 %v665_v28 }
 0x1da   :  { %589 = vmatpush.msra.mxu0 %v560_v29  ;;  %v664_v29 = vld [vmem:[#allocation11 + $0x10] sm:$0xff] }
 0x1db   :  { %1390 = vmatpush.xpose.msk.msrb.mxu1 %vm304_vm3, %v397_v3  ;;  %689 = vmatpush.msra.mxu2 %v664_v29 }
 0x1df   :  { %1391 = vmatpush.xpose.msk.msrb.mxu1 %vm304_vm3, %v396_v6 }
 0x1e2   :  { %1392 = vmatmul.msk.f32.vlgmr.msrb.gmra.mxu1 %vm304_vm3, %v329_v7 }
 0x1ea   :  { %1393 = vmatmul.msk.f32.gmra.mxu1 %vm304_vm3, %v332_v9 }
 0x25f   :  { %v459_v11 = vpop.f32.mrf.mxu1 }
 0x260   :  { %v460_v12 = vadd.f32 %v459_v11, %v2185_v10 }
 0x262   :  { %v466_v13 = vsel %vm465_vm4, %v460_v12, -inf }
 0x263   :  { %467 = vmax.xlane.f32.xlu1 %v466_v13 }
 0x267   :  { %v462_v15 = vpop.f32.mrf.mxu1 }
 0x268   :  { %v463_v16 = vadd.f32 %v462_v15, %v2189_v14 }
 0x26a   :  { %v469_v17 = vsel %vm465_vm4, %v463_v16, -inf }
 0x26b   :  { %470 = vmax.xlane.f32.xlu1 %v469_v17 }
 0x2d6   :  { %v468_v18 = vpop.xlane.xlu1 %467 }
 0x2d7   :  { %v472_v19 = vsub.f32 %v460_v12, %v468_v18  ;;  %v1844_v12 = vmov 32.0  }
 0x2d9   :  { %v474_v20 = vmul.f32 1.442695, %v472_v19 }
 0x2db   :  { %1516 = vpow2.f32 %v474_v20 }
 0x2de   :  { %v471_v21 = vpop.xlane.xlu1 %470 }
 0x2df   :  { %v473_v22 = vsub.f32 %v463_v16, %v471_v21 }
 0x2e1   :  { %v1517_v23 = vpop.eup %1516  ;;  %v476_v24 = vmul.f32 1.442695, %v473_v22 }
 0x2e2   :  { %1394 = vmatmul.msk.f32.vlgmr.msrb.gmra.mxu0 %vm465_vm4, %v1517_v23  ;;  %1396 = vmatmul.msk.f32.vlgmr.msrb.gmra.mxu3 %vm465_vm4, %v1517_v23 }
 0x2e3   :  { %1518 = vpow2.f32 %v476_v24 }
 0x2e9   :  { %v1519_v25 = vpop.eup %1518 }
 0x2ea   :  { %1395 = vmatmul.msk.f32.vlgmr.msrb.gmra.mxu2 %vm465_vm4, %v1519_v25  ;;  %1397 = vmatmul.msk.f32.gmra.mxu3 %vm465_vm4, %v1519_v25 }
 0x35f   :  { %v501_v53 = vpop.f32.mrf.mxu0 }
 0x365   :  { %v524_v31 = vpop.f32.mrf.mxu3 }
 0x366   :  { %1520 = vrcp.f32 %v524_v31  ;;  %v541_v45 = vand.u32 2147483648, %v524_v31  ;;  %v539_v47 = vand.u32 2147483647, %v524_v31  ;;  %vm535_vm6 = vweird.f32 %v524_v31 }
 0x368   :  { %v542_v50 = vor.u32 1.1754944e-38, %v541_v45  ;;  %vm540_vm8 = vcmp.eq.f32.partialorder %v539_v47, 8.507059e+37  ;;  %v708_v45 = vld [vmem:[%s2465_s19 + $0x38] sm:$0xff]  ;;  %v706_v47 = vld [vmem:[%s2465_s19 + $0x28] sm:$0xff] }
 0x369   :  { %727 = vmatpush.msra.mxu3 %v708_v45 }
 0x36c   :  { %v1521_v32 = vpop.eup %1520 }
 0x36d   :  { %v531_v33 = vmul.f32 %v1521_v32, %v524_v31  ;;  %v527_v43 = vpop.f32.mrf.mxu3  ;;  %vm536_vm5 = vweird.f32 %v1521_v32  ;;  %v504_v63 = vpop.f32.mrf.mxu2  ;;  %v663_v31 = vld [vmem:[#allocation11 + $0x8] sm:$0xff] }
 0x36e   :  { %1522 = vrcp.f32 %v527_v43  ;;  %vm537_vm7 = vmor %vm535_vm6, %vm536_vm5  ;;  %v556_v57 = vand.u32 2147483648, %v527_v43  ;;  %v554_v59 = vand.u32 2147483647, %v527_v43  ;;  %vm550_vm10 = vweird.f32 %v527_v43  ;;  %690 = vmatpush.msra.mxu2 %v663_v31 }
 0x36f   :  { %v532_v44 = vsub.f32 1.0, %v531_v33  ;;  %1524 = vrcp.f32 %v1844_v12 }
 0x370   :  { %v557_v61 = vor.u32 1.1754944e-38, %v556_v57  ;;  %vm555_vm12 = vcmp.eq.f32.partialorder %v554_v59, 8.507059e+37 }
 0x371   :  { %v533_v46 = vmul.f32 %v1521_v32, %v532_v44 }
 0x373   :  { %v534_v48 = vadd.f32 %v1521_v32, %v533_v46  ;;  %v707_v46 = vld [vmem:[%s2465_s19 + $0x30] sm:$0xff] }
 0x374   :  { %v1523_v49 = vpop.eup %1522  ;;  %728 = vmatpush.msra.mxu3 %v707_v46 }
 0x375   :  { %v538_v51 = vsel %vm537_vm7, %v1521_v32, %v534_v48  ;;  %v546_v52 = vmul.f32 %v1523_v49, %v527_v43  ;;  %vm551_vm9 = vweird.f32 %v1523_v49  ;;  %v1525_v13 = vpop.eup %1524  ;;  %v662_v32 = vld [vmem:[#allocation11] sm:$0xff] }
 0x376   :  { %v543_v54 = vsel %vm540_vm8, %v542_v50, %v538_v51  ;;  %vm552_vm11 = vmor %vm550_vm10, %vm551_vm9  ;;  %v608_v15 = vmul.f32 32.0, %v1525_v13  ;;  %vm612_vm13 = vweird.f32 %v1525_v13  ;;  %691 = vmatpush.msra.mxu2 %v662_v32  ;;  %v705_v50 = vld [vmem:[%s2465_s19 + $0x20] sm:$0xff]  ;;  %729 = vmatpush.msra.mxu3 %v706_v47 }
 0x377   :  { %v547_v55 = vsub.f32 1.0, %v546_v52  ;;  %v544_v56 = vmul.f32 %v543_v54, %v501_v53  ;;  %v704_v53 = vld [vmem:[%s2465_s19 + $0x18] sm:$0xff] }
 0x378   :  { %v609_v16 = vsub.f32 1.0, %v608_v15  ;;  %730 = vmatpush.msra.mxu3 %v705_v50  ;;  %v701_v15 = vld [vmem:[%s2465_s19] sm:$0xff] }
 0x379   :  { %v548_v58 = vmul.f32 %v1523_v49, %v547_v55  ;;  %1398 = vmatmul.msk.f32.vlgmr.msra.gmra.mxu0 %vm304_vm3, %v544_v56  ;;  %v703_v55 = vld [vmem:[%s2465_s19 + $0x10] sm:$0xff] }
 0x37a   :  { %v610_v17 = vmul.f32 %v1525_v13, %v609_v16  ;;  %731 = vmatpush.msra.mxu3 %v704_v53  ;;  %v1501_v16 = vld [vmem:[#allocation13] ss:$0 sm:$0xff] }
 0x37b   :  { %v549_v60 = vadd.f32 %v1523_v49, %v548_v58  ;;  %v1421_v53 = vld [vmem:[%s2455_s9 + $0x38] sm:$0xff] }
 0x37c   :  { %v611_v18 = vadd.f32 %v1525_v13, %v610_v17  ;;  %732 = vmatpush.msra.mxu3 %v703_v55  ;;  %894 = vmatpush.msrb.mxu2 %v1421_v53  ;;  %v1406_v55 = vld [vmem:[%s2488_s3 + $0x30] sm:$0xff] }
 0x37d   :  { %v553_v62 = vsel %vm552_vm11, %v1523_v49, %v549_v60 }
 0x37e   :  { %v558_v0 = vsel %vm555_vm12, %v557_v61, %v553_v62  ;;  %v2218_v19 = vsel %vm612_vm13, %v1525_v13, %v611_v18  ;;  %v1499_v62 = vld [vmem:[#allocation5] ss:$0 sm:$0xff]  ;;  %v702_v13 = vld [vmem:[%s2465_s19 + $0x8] sm:$0xff] }
 0x37f   :  { %v559_v1 = vmul.f32 %v558_v0, %v504_v63  ;;  %733 = vmatpush.msra.mxu3 %v702_v13 }
 0x381   :  { %1399 = vmatmul.msk.f32.gmra.mxu0 %vm304_vm3, %v559_v1  ;;  %734 = vmatpush.msra.mxu3 %v701_v15  ;;  %v1503_v15 = vld [vmem:[#allocation8] ss:$0 sm:$0xff] }
 0x3f6   :  { %v591_v3 = vpop.f32.mrf.mxu0 }
 0x3f7   :  { %v592_v4 = vadd.f32 %v1498_v2, %v591_v3 }
 0x3f9   :  { %v597_v5 = vadd.f32 %v592_v4, %v2083_v30 }
 0x3fb   :  { %v601_v6 = vsel %vm304_vm3, %v597_v5, 0.0 }
 0x3fc   :  { %602 = vadd.xlane.f32.xlu2 %v601_v6 }
 0x3fe   :  { %v594_v7 = vpop.f32.mrf.mxu0 }
 0x3ff   :  { %v595_v8 = vadd.f32 %v1498_v2, %v594_v7  ;;  %v1500_v2 = vld [vmem:[#allocation7] ss:$0 sm:$0xff] }
 0x401   :  { %v598_v9 = vadd.f32 %v595_v8, %v2094_v34 }
 0x403   :  { %v604_v11 = vsel %vm304_vm3, %v598_v9, 0.0 }
 0x404   :  { %605 = vadd.xlane.f32.xlu2 %v604_v11 }
 0x46f   :  { %v603_v30 = vpop.xlane.xlu2 %602 }
 0x470   :  { %v614_v20 = vmul.f32 %v2218_v19, %v603_v30 }
 0x472   :  { %v616_v21 = vsub.f32 %v597_v5, %v614_v20 }
 0x474   :  { %v618_v22 = vmul.f32 %v616_v21, %v616_v21 }
 0x476   :  { %v620_v34 = vsel %vm304_vm3, %v618_v22, 0.0 }
 0x477   :  { %621 = vadd.xlane.f32.xlu0 %v620_v34  ;;  %v606_v23 = vpop.xlane.xlu2 %605  ;;  %v1502_v34 = vld [vmem:[#allocation14] ss:$0 sm:$0xff] }
 0x478   :  { %v615_v24 = vmul.f32 %v2218_v19, %v606_v23 }
 0x47a   :  { %v617_v25 = vsub.f32 %v598_v9, %v615_v24 }
 0x47c   :  { %v619_v26 = vmul.f32 %v617_v25, %v617_v25 }
 0x47e   :  { %v623_v27 = vsel %vm304_vm3, %v619_v26, 0.0 }
 0x47f   :  { %624 = vadd.xlane.f32.xlu1 %v623_v27 }
 0x4ea   :  { %v622_v33 = vpop.xlane.xlu0 %621 }
 0x4eb   :  { %v626_v43 = vmul.f32 %v622_v33, %v2218_v19 }
 0x4ed   :  { %v628_v44 = vadd.f32 1e-05, %v626_v43 }
 0x4ef   :  { %1526 = vrsqrt.f32 %v628_v44  ;;  %vm636_vm15 = vweird.f32 %v628_v44 }
 0x4f2   :  { %v625_v48 = vpop.xlane.xlu1 %624 }
 0x4f3   :  { %v627_v49 = vmul.f32 %v625_v48, %v2218_v19 }
 0x4f5   :  { %v1527_v51 = vpop.eup %1526  ;;  %v629_v52 = vadd.f32 1e-05, %v627_v49 }
 0x4f6   :  { %v631_v54 = vmul.f32 %v1527_v51, %v628_v44  ;;  %vm637_vm14 = vweird.f32 %v1527_v51 }
 0x4f7   :  { %1528 = vrsqrt.f32 %v629_v52  ;;  %vm638_vm0 = vmor %vm636_vm15, %vm637_vm14  ;;  %vm646_vm2 = vweird.f32 %v629_v52 }
 0x4f8   :  { %v632_v56 = vmul.f32 %v1527_v51, %v631_v54  ;;  %v1413_v54 = vld [vmem:[%s2489_s21 + $0x30] sm:$0xff] }
 0x4fa   :  { %v633_v57 = vmul.f32 0.5, %v632_v56  ;;  %v1420_v56 = vld [vmem:[%s2455_s9 + $0x30] sm:$0xff] }
 0x4fb   :  { %895 = vmatpush.msrb.mxu2 %v1420_v56 }
 0x4fc   :  { %v634_v58 = vsub.f32 1.5, %v633_v57  ;;  %v1412_v57 = vld [vmem:[%s2489_s21 + $0x28] sm:$0xff] }
 0x4fd   :  { %v1529_v59 = vpop.eup %1528 }
 0x4fe   :  { %v635_v60 = vmul.f32 %v1527_v51, %v634_v58  ;;  %v641_v61 = vmul.f32 %v1529_v59, %v629_v52  ;;  %vm647_vm1 = vweird.f32 %v1529_v59  ;;  %v1407_v52 = vld [vmem:[%s2488_s3 + $0x38] sm:$0xff]  ;;  %v1405_v58 = vld [vmem:[%s2488_s3 + $0x28] sm:$0xff] }
 0x4ff   :  { %vm648_vm5 = vmor %vm646_vm2, %vm647_vm1  ;;  %828 = vmatpush.msrb.mxu0 %v1407_v52 }
 0x500   :  { %v639_v63 = vsel %vm638_vm0, %v1527_v51, %v635_v60  ;;  %v642_v0 = vmul.f32 %v1529_v59, %v641_v61  ;;  %v1414_v51 = vld [vmem:[%s2489_s21 + $0x38] sm:$0xff]  ;;  %v1411_v60 = vld [vmem:[%s2489_s21 + $0x20] sm:$0xff] }
 0x501   :  { %v650_v1 = vmul.f32 %v639_v63, %v616_v21  ;;  %861 = vmatpush.msra.mxu1 %v1414_v51  ;;  %829 = vmatpush.msrb.mxu0 %v1406_v55  ;;  %v1404_v61 = vld [vmem:[%s2488_s3 + $0x20] sm:$0xff] }
 0x502   :  { %v643_v3 = vmul.f32 0.5, %v642_v0 }
 0x503   :  { %v655_v4 = vmul.f32 %v1499_v62, %v650_v1  ;;  %862 = vmatpush.msra.mxu1 %v1413_v54  ;;  %830 = vmatpush.msrb.mxu0 %v1405_v58 }
 0x504   :  { %v644_v5 = vsub.f32 1.5, %v643_v3 }
 0x505   :  { %v660_v6 = vadd.f32 %v1500_v2, %v655_v4  ;;  %863 = vmatpush.msra.mxu1 %v1412_v57  ;;  %831 = vmatpush.msrb.mxu0 %v1404_v61 }
 0x506   :  { %v645_v7 = vmul.f32 %v1529_v59, %v644_v5 }
 0x507   :  { %1400 = vmatmul.msk.f32.vlgmr.msra.gmra.mxu2 %vm304_vm3, %v660_v6  ;;  %864 = vmatpush.msra.mxu1 %v1411_v60 }
 0x508   :  { %v649_v8 = vsel %vm648_vm5, %v1529_v59, %v645_v7  ;;  %v1419_v59 = vld [vmem:[%s2455_s9 + $0x28] sm:$0xff] }
 0x509   :  { %v651_v9 = vmul.f32 %v649_v8, %v617_v25  ;;  %896 = vmatpush.msrb.mxu2 %v1419_v59  ;;  %1023 = vmatpush.msrb.mxu1 %v2105_v35 }
 0x50b   :  { %v656_v11 = vmul.f32 %v1499_v62, %v651_v9  ;;  %v1418_v62 = vld [vmem:[%s2455_s9 + $0x20] sm:$0xff]  ;;  %1024 = vmatpush.msrb.mxu1 %v2111_v36 }
 0x50c   :  { %897 = vmatpush.msrb.mxu2 %v1418_v62 }
 0x50d   :  { %v661_v12 = vadd.f32 %v1500_v2, %v656_v11  ;;  %1025 = vmatpush.msrb.mxu1 %v2117_v37 }
 0x50f   :  { %1401 = vmatmul.msk.f32.gmra.mxu2 %vm304_vm3, %v661_v12  ;;  %1026 = vmatpush.msrb.mxu1 %v2123_v38 }
 0x511   :  { %1027 = vmatpush.msrb.mxu1 %v2129_v39 }
 0x513   :  { %1028 = vmatpush.msrb.mxu1 %v2135_v40 }
 0x515   :  { %1029 = vmatpush.msrb.mxu1 %v2141_v41 }
 0x517   :  { %1030 = vmatpush.msrb.mxu1 %v2147_v42 }
 0x58a   :  { %v693_v17 = vpop.f32.mrf.mxu2 }
 0x58b   :  { %v694_v18 = vadd.f32 %v1501_v16, %v693_v17 }
 0x58d   :  { %v699_v30 = vmax.f32 %v694_v18, 0.0 }
 0x58f   :  { %1402 = vmatmul.msk.f32.vlgmr.msra.gmra.mxu3 %vm465_vm4, %v699_v30  ;;  %v1504_v30 = vld [vmem:[#allocation10] ss:$0 sm:$0xff] }
 0x592   :  { %v696_v20 = vpop.f32.mrf.mxu2 }
 0x593   :  { %v697_v21 = vadd.f32 %v1501_v16, %v696_v20 }
 0x595   :  { %v700_v22 = vmax.f32 %v697_v21, 0.0 }
 0x597   :  { %1403 = vmatmul.msk.f32.gmra.mxu3 %vm465_vm4, %v700_v22 }
 0x612   :  { %v736_v23 = vpop.f32.mrf.mxu3 }
 0x613   :  { %v737_v24 = vadd.f32 %v1502_v34, %v736_v23 }
 0x615   :  { %v742_v25 = vadd.f32 %v737_v24, %v660_v6 }
 0x617   :  { %v746_v26 = vsel %vm304_vm3, %v742_v25, 0.0 }
 0x618   :  { %747 = vadd.xlane.f32.xlu2 %v746_v26 }
 0x61a   :  { %v739_v27 = vpop.f32.mrf.mxu3 }
 0x61b   :  { %v740_v28 = vadd.f32 %v1502_v34, %v739_v27 }
 0x61d   :  { %v743_v29 = vadd.f32 %v740_v28, %v661_v12 }
 0x61f   :  { %v749_v31 = vsel %vm304_vm3, %v743_v29, 0.0 }
 0x620   :  { %750 = vadd.xlane.f32.xlu1 %v749_v31 }
 0x68b   :  { %v748_v32 = vpop.xlane.xlu2 %747 }
 0x68c   :  { %v752_v33 = vmul.f32 %v748_v32, %v2218_v19 }
 0x68e   :  { %v2257_v43 = vsub.f32 %v742_v25, %v752_v33 }
 0x690   :  { %v756_v44 = vmul.f32 %v2257_v43, %v2257_v43 }
 0x692   :  { %v758_v45 = vsel %vm304_vm3, %v756_v44, 0.0 }
 0x693   :  { %v751_v46 = vpop.xlane.xlu1 %750  ;;  %759 = vadd.xlane.f32.xlu2 %v758_v45  ;;  %v1507_v45 = vld [vmem:[%s2456_s10 + $0x1] ss:$0 sm:$0xff] }
 0x694   :  { %v753_v47 = vmul.f32 %v751_v46, %v2218_v19 }
 0x696   :  { %v2263_v48 = vsub.f32 %v743_v29, %v753_v47  ;;  %v1506_v29 = vld [vmem:[%s2454_s8 + $0x1] ss:$0 sm:$0xff] }
 0x698   :  { %v757_v49 = vmul.f32 %v2263_v48, %v2263_v48 }
 0x69a   :  { %v761_v50 = vsel %vm304_vm3, %v757_v49, 0.0 }
 0x69b   :  { %762 = vadd.xlane.f32.xlu1 %v761_v50 }
 0x706   :  { %v760_v63 = vpop.xlane.xlu2 %759 }
 0x707   :  { %v764_v0 = vmul.f32 %v760_v63, %v2218_v19 }
 0x709   :  { %v766_v1 = vadd.f32 1e-05, %v764_v0 }
 0x70b   :  { %1530 = vrsqrt.f32 %v766_v1  ;;  %vm774_vm7 = vweird.f32 %v766_v1 }
 0x70e   :  { %v763_v2 = vpop.xlane.xlu1 %762 }
 0x70f   :  { %v765_v3 = vmul.f32 %v763_v2, %v2218_v19 }
 0x711   :  { %v1531_v4 = vpop.eup %1530  ;;  %v767_v5 = vadd.f32 1e-05, %v765_v3 }
 0x712   :  { %v769_v6 = vmul.f32 %v1531_v4, %v766_v1  ;;  %vm775_vm6 = vweird.f32 %v1531_v4 }
 0x713   :  { %1532 = vrsqrt.f32 %v767_v5  ;;  %vm776_vm8 = vmor %vm774_vm7, %vm775_vm6  ;;  %vm784_vm10 = vweird.f32 %v767_v5 }
 0x714   :  { %v770_v7 = vmul.f32 %v1531_v4, %v769_v6 }
 0x716   :  { %v771_v8 = vmul.f32 0.5, %v770_v7 }
 0x718   :  { %v772_v9 = vsub.f32 1.5, %v771_v8 }
 0x719   :  { %v1533_v11 = vpop.eup %1532 }
 0x71a   :  { %v773_v12 = vmul.f32 %v1531_v4, %v772_v9  ;;  %v779_v13 = vmul.f32 %v1533_v11, %v767_v5  ;;  %vm785_vm9 = vweird.f32 %v1533_v11 }
 0x71b   :  { %vm786_vm11 = vmor %vm784_vm10, %vm785_vm9 }
 0x71c   :  { %v777_v16 = vsel %vm776_vm8, %v1531_v4, %v773_v12  ;;  %v780_v17 = vmul.f32 %v1533_v11, %v779_v13  ;;  %v1440_v12 = vld [vmem:[%s2457_s11 + $0x28] sm:$0xff]  ;;  %v1439_v13 = vld [vmem:[%s2457_s11 + $0x20] sm:$0xff] }
 0x71d   :  { %v788_v18 = vmul.f32 %v777_v16, %v2257_v43 }
 0x71e   :  { %v781_v20 = vmul.f32 0.5, %v780_v17 }
 0x71f   :  { %v793_v21 = vmul.f32 %v1503_v15, %v788_v18 }
 0x720   :  { %v782_v22 = vsub.f32 1.5, %v781_v20 }
 0x721   :  { %v2315_v34 = vadd.f32 %v1504_v30, %v793_v21 }
 0x722   :  { %v783_v23 = vmul.f32 %v1533_v11, %v782_v22 }
 0x723   :  { %1409 = vmatmul.msk.f32.vlgmr.msrb.gmra.mxu0 %vm304_vm3, %v2315_v34  ;;  %1416 = vmatmul.msk.f32.vlgmr.msra.gmra.mxu1 %vm304_vm3, %v2315_v34 }
 0x724   :  { %v787_v24 = vsel %vm786_vm11, %v1533_v11, %v783_v23  ;;  %1423 = vmatmul.msk.f32.vlgmr.msrb.gmra.mxu2 %vm304_vm3, %v2315_v34  ;;  %v1441_v11 = vld [vmem:[%s2457_s11 + $0x30] sm:$0xff] }
 0x725   :  { %v789_v25 = vmul.f32 %v787_v24, %v2263_v48 }
 0x727   :  { %v794_v26 = vmul.f32 %v1503_v15, %v789_v25 }
 0x729   :  { %v2324_v27 = vadd.f32 %v1504_v30, %v794_v26 }
 0x72b   :  { %1410 = vmatmul.msk.f32.gmra.mxu0 %vm304_vm3, %v2324_v27  ;;  %1417 = vmatmul.msk.f32.gmra.mxu1 %vm304_vm3, %v2324_v27 }
 0x72c   :  { %1424 = vmatmul.msk.f32.gmra.mxu2 %vm304_vm3, %v2324_v27 }
 0x7a0   :  { %v866_v28 = vpop.f32.mrf.mxu1  ;;  %v833_v59 = vpop.f32.mrf.mxu0 }
 0x7a1   :  { %v867_v43 = vadd.f32 %v1506_v29, %v866_v28 }
 0x7a3   :  { %v911_v47 = vmul.f32 %v867_v43, %v2111_v36  ;;  %v909_v54 = vmul.f32 %v867_v43, %v2123_v38  ;;  %v907_v57 = vmul.f32 %v867_v43, %v2135_v40  ;;  %v905_v60 = vmul.f32 %v867_v43, %v2147_v42 }
 0x7a7   :  { %v899_v31 = vpop.f32.mrf.mxu2 }
 0x7a8   :  { %v869_v32 = vpop.f32.mrf.mxu1  ;;  %v900_v48 = vadd.f32 %v1507_v45, %v899_v31  ;;  %v836_v61 = vpop.f32.mrf.mxu0 }
 0x7a9   :  { %v870_v33 = vadd.f32 %v1506_v29, %v869_v32 }
 0x7aa   :  { %v919_v52 = vmul.f32 %v900_v48, %v2111_v36  ;;  %v917_v55 = vmul.f32 %v900_v48, %v2123_v38  ;;  %v915_v36 = vmul.f32 %v900_v48, %v2135_v40  ;;  %v913_v38 = vmul.f32 %v900_v48, %v2147_v42 }
 0x7ab   :  { %v912_v44 = vmul.f32 %v870_v33, %v2105_v35  ;;  %v910_v51 = vmul.f32 %v870_v33, %v2117_v37  ;;  %v908_v56 = vmul.f32 %v870_v33, %v2129_v39  ;;  %v906_v58 = vmul.f32 %v870_v33, %v2141_v41 }
 0x7ad   :  { %1425 = vmatpush.xpose.msk.msrb.mxu3 %vm304_vm3, %v912_v44 }
 0x7af   :  { %v902_v46 = vpop.f32.mrf.mxu2 }
 0x7b0   :  { %v903_v49 = vadd.f32 %v1507_v45, %v902_v46 }
 0x7b1   :  { %1426 = vmatpush.xpose.msk.msrb.mxu3 %vm304_vm3, %v911_v47 }
 0x7b2   :  { %v920_v50 = vmul.f32 %v903_v49, %v2105_v35  ;;  %v918_v53 = vmul.f32 %v903_v49, %v2117_v37  ;;  %v916_v35 = vmul.f32 %v903_v49, %v2129_v39  ;;  %v914_v37 = vmul.f32 %v903_v49, %v2141_v41  ;;  %v1505_v39 = vld [vmem:[%s2492_s7 + $0x1] ss:$0 sm:$0xff] }
 0x7b3   :  { %v834_v40 = vadd.f32 %v1505_v39, %v833_v59  ;;  %v837_v62 = vadd.f32 %v1505_v39, %v836_v61 }
 0x7b4   :  { %1000 = vmatpush.msra.mxu0 %v920_v50 }
 0x7b5   :  { %1427 = vmatpush.xpose.msk.msrb.mxu3 %vm304_vm3, %v910_v51 }
 0x7b6   :  { %1001 = vmatpush.msra.mxu0 %v919_v52  ;;  %v1508_v52 = vld [vmem:[%s2458_s12 + $0x1] ss:$0 sm:$0xff] }
 0x7b8   :  { %1002 = vmatpush.msra.mxu0 %v918_v53 }
 0x7b9   :  { %1428 = vmatpush.xpose.msk.msrb.mxu3 %vm304_vm3, %v909_v54 }
 0x7ba   :  { %1003 = vmatpush.msra.mxu0 %v917_v55 }
 0x7bc   :  { %1004 = vmatpush.msra.mxu0 %v916_v35 }
 0x7bd   :  { %1429 = vmatpush.xpose.msk.msrb.mxu3 %vm304_vm3, %v908_v56 }
 0x7be   :  { %1005 = vmatpush.msra.mxu0 %v915_v36 }
 0x7c0   :  { %1006 = vmatpush.msra.mxu0 %v914_v37 }
 0x7c1   :  { %1430 = vmatpush.xpose.msk.msrb.mxu3 %vm304_vm3, %v907_v57 }
 0x7c2   :  { %1007 = vmatpush.msra.mxu0 %v913_v38 }
 0x7c5   :  { %1431 = vmatpush.xpose.msk.msrb.mxu3 %vm304_vm3, %v906_v58 }
 0x7c9   :  { %1432 = vmatpush.xpose.msk.msrb.mxu3 %vm304_vm3, %v905_v60 }
 0x7cc   :  { %1433 = vmatmul.msk.f32.vlgmr.msrb.gmra.mxu3 %vm304_vm3, %v834_v40 }
 0x7d4   :  { %1434 = vmatmul.msk.f32.gmra.mxu3 %vm304_vm3, %v837_v62 }
 0x84f   :  { %v968_v63 = vpop.f32.mrf.mxu3 }
 0x850   :  { %v969_v41 = vadd.f32 %v968_v63, %v2185_v10 }
 0x852   :  { %v974_v0 = vsel %vm465_vm4, %v969_v41, -inf }
 0x853   :  { %975 = vmax.xlane.f32.xlu2 %v974_v0  ;;  %v1169_v0 = vld [vmem:[#allocation11 + $0x28] sm:$0xff] }
 0x857   :  { %v971_v1 = vpop.f32.mrf.mxu3 }
 0x858   :  { %v972_v2 = vadd.f32 %v971_v1, %v2189_v14  ;;  %v1442_v14 = vld [vmem:[%s2457_s11 + $0x38] sm:$0xff] }
 0x859   :  { %1096 = vmatpush.msra.mxu2 %v1442_v14  ;;  %v1168_v1 = vld [vmem:[#allocation11 + $0x20] sm:$0xff] }
 0x85a   :  { %v977_v42 = vsel %vm465_vm4, %v972_v2, -inf }
 0x85b   :  { %978 = vmax.xlane.f32.xlu1 %v977_v42  ;;  %1097 = vmatpush.msra.mxu2 %v1441_v11  ;;  %v1451_v11 = vld [vmem:[%s2465_s19 + $0x58] sm:$0xff] }
 0x85d   :  { %1098 = vmatpush.msra.mxu2 %v1440_v12 }
 0x85f   :  { %1099 = vmatpush.msra.mxu2 %v1439_v13 }
 0x8c6   :  { %v976_v3 = vpop.xlane.xlu2 %975 }
 0x8c7   :  { %v980_v4 = vsub.f32 %v969_v41, %v976_v3  ;;  %v1170_v41 = vld [vmem:[#allocation11 + $0x30] sm:$0xff] }
 0x8c9   :  { %v982_v5 = vmul.f32 1.442695, %v980_v4  ;;  %v1455_v4 = vld [vmem:[%s2465_s19 + $0x78] sm:$0xff] }
 0x8ca   :  { %1236 = vmatpush.msra.mxu1 %v1455_v4  ;;  %1468 = vmatpush.msra.mxu3 %v1455_v4 }
 0x8cb   :  { %1534 = vpow2.f32 %v982_v5  ;;  %v1454_v5 = vld [vmem:[%s2465_s19 + $0x70] sm:$0xff] }
 0x8cc   :  { %1237 = vmatpush.msra.mxu1 %v1454_v5  ;;  %1469 = vmatpush.msra.mxu3 %v1454_v5 }
 0x8ce   :  { %v979_v6 = vpop.xlane.xlu1 %978 }
 0x8cf   :  { %v981_v7 = vsub.f32 %v972_v2, %v979_v6  ;;  %v1453_v6 = vld [vmem:[%s2465_s19 + $0x68] sm:$0xff] }
 0x8d0   :  { %1238 = vmatpush.msra.mxu1 %v1453_v6  ;;  %1470 = vmatpush.msra.mxu3 %v1453_v6 }
 0x8d1   :  { %v1535_v8 = vpop.eup %1534  ;;  %v984_v9 = vmul.f32 1.442695, %v981_v7 }
 0x8d2   :  { %1435 = vmatmul.msk.f32.vlgmr.msra.gmra.mxu0 %vm465_vm4, %v1535_v8  ;;  %1437 = vmatmul.msk.f32.vlgmr.msrb.gmra.mxu1 %vm465_vm4, %v1535_v8 }
 0x8d3   :  { %1536 = vpow2.f32 %v984_v9  ;;  %v1452_v9 = vld [vmem:[%s2465_s19 + $0x60] sm:$0xff] }
 0x8d4   :  { %1239 = vmatpush.msra.mxu1 %v1452_v9  ;;  %1471 = vmatpush.msra.mxu3 %v1452_v9 }
 0x8d6   :  { %1240 = vmatpush.msra.mxu1 %v1451_v11  ;;  %1472 = vmatpush.msra.mxu3 %v1451_v11 }
 0x8d9   :  { %v1537_v10 = vpop.eup %1536 }
 0x8da   :  { %1436 = vmatmul.msk.f32.gmra.mxu0 %vm465_vm4, %v1537_v10  ;;  %1438 = vmatmul.msk.f32.gmra.mxu1 %vm465_vm4, %v1537_v10 }
 0x94f   :  { %v1032_v15 = vpop.f32.mrf.mxu1  ;;  %v1009_v25 = vpop.f32.mrf.mxu0 }
 0x950   :  { %1538 = vrcp.f32 %v1032_v15  ;;  %v1049_v20 = vand.u32 2147483648, %v1032_v15  ;;  %v1047_v22 = vand.u32 2147483647, %v1032_v15  ;;  %vm1043_vm13 = vweird.f32 %v1032_v15 }
 0x952   :  { %v1050_v26 = vor.u32 1.1754944e-38, %v1049_v20  ;;  %vm1048_vm15 = vcmp.eq.f32.partialorder %v1047_v22, 8.507059e+37  ;;  %v1509_v20 = vld [vmem:[#allocation5 + $0x1] ss:$0 sm:$0xff] }
 0x956   :  { %v1539_v16 = vpop.eup %1538 }
 0x957   :  { %v1039_v17 = vmul.f32 %v1539_v16, %v1032_v15  ;;  %v1035_v18 = vpop.f32.mrf.mxu1  ;;  %vm1044_vm12 = vweird.f32 %v1539_v16  ;;  %v1012_v49 = vpop.f32.mrf.mxu0 }
 0x958   :  { %1540 = vrcp.f32 %v1035_v18  ;;  %vm1045_vm14 = vmor %vm1043_vm13, %vm1044_vm12  ;;  %v1064_v43 = vand.u32 2147483648, %v1035_v18  ;;  %v1062_v45 = vand.u32 2147483647, %v1035_v18  ;;  %vm1058_vm1 = vweird.f32 %v1035_v18 }
 0x959   :  { %v1040_v30 = vsub.f32 1.0, %v1039_v17 }
 0x95a   :  { %v1065_v47 = vor.u32 1.1754944e-38, %v1064_v43  ;;  %vm1063_vm5 = vcmp.eq.f32.partialorder %v1062_v45, 8.507059e+37  ;;  %v1450_v45 = vld [vmem:[%s2465_s19 + $0x50] sm:$0xff] }
 0x95b   :  { %v1041_v21 = vmul.f32 %v1539_v16, %v1040_v30  ;;  %1241 = vmatpush.msra.mxu1 %v1450_v45  ;;  %1473 = vmatpush.msra.mxu3 %v1450_v45 }
 0x95d   :  { %v1042_v23 = vadd.f32 %v1539_v16, %v1041_v21 }
 0x95e   :  { %v1541_v24 = vpop.eup %1540 }
 0x95f   :  { %v1046_v28 = vsel %vm1045_vm14, %v1539_v16, %v1042_v23  ;;  %v1054_v29 = vmul.f32 %v1541_v24, %v1035_v18  ;;  %vm1059_vm0 = vweird.f32 %v1541_v24 }
 0x960   :  { %v1051_v31 = vsel %vm1048_vm15, %v1050_v26, %v1046_v28  ;;  %vm1060_vm2 = vmor %vm1058_vm1, %vm1059_vm0 }
 0x961   :  { %v1055_v32 = vsub.f32 1.0, %v1054_v29  ;;  %v1052_v33 = vmul.f32 %v1051_v31, %v1009_v25 }
 0x963   :  { %v1056_v44 = vmul.f32 %v1541_v24, %v1055_v32  ;;  %1444 = vmatmul.msk.f32.vlgmr.msra.gmra.mxu2 %vm304_vm3, %v1052_v33 }
 0x965   :  { %v1057_v46 = vadd.f32 %v1541_v24, %v1056_v44 }
 0x967   :  { %v1061_v48 = vsel %vm1060_vm2, %v1541_v24, %v1057_v46  ;;  %v1510_v24 = vld [vmem:[#allocation7 + $0x1] ss:$0 sm:$0xff]  ;;  %v1449_v46 = vld [vmem:[%s2465_s19 + $0x48] sm:$0xff] }
 0x968   :  { %v1066_v50 = vsel %vm1063_vm5, %v1065_v47, %v1061_v48  ;;  %v1448_v47 = vld [vmem:[%s2465_s19 + $0x40] sm:$0xff]  ;;  %1242 = vmatpush.msra.mxu1 %v1449_v46  ;;  %1474 = vmatpush.msra.mxu3 %v1449_v46  ;;  %v1511_v48 = vld [vmem:[#allocation13 + $0x1] ss:$0 sm:$0xff]  ;;  %s1845_s19 = smov [#allocation19]  }
 0x969   :  { %v1067_v51 = vmul.f32 %v1066_v50, %v1012_v49  ;;  %s1354_s10 = sshll.u32 %s1845_s19, 4  ;;  %s1355_s10 = int_to_ptr.vmem [resolvable:$true] %s1354_s10 }
 0x96a   :  { %1243 = vmatpush.msra.mxu1 %v1448_v47  ;;  %1475 = vmatpush.msra.mxu3 %v1448_v47 }
 0x96b   :  { %1445 = vmatmul.msk.f32.gmra.mxu2 %vm304_vm3, %v1067_v51 }
 0x9e6   :  { %v1101_v53 = vpop.f32.mrf.mxu2 }
 0x9e7   :  { %v1102_v54 = vadd.f32 %v1508_v52, %v1101_v53 }
 0x9e9   :  { %v1107_v55 = vadd.f32 %v1102_v54, %v2315_v34 }
 0x9eb   :  { %v1113_v35 = vsel %vm304_vm3, %v1107_v55, 0.0 }
 0x9ec   :  { %1114 = vadd.xlane.f32.xlu2 %v1113_v35 }
 0x9ee   :  { %v1104_v56 = vpop.f32.mrf.mxu2 }
 0x9ef   :  { %v1105_v36 = vadd.f32 %v1508_v52, %v1104_v56 }
 0x9f1   :  { %v1108_v37 = vadd.f32 %v1105_v36, %v2324_v27  ;;  %v1171_v27 = vld [vmem:[#allocation11 + $0x38] sm:$0xff] }
 0x9f2   :  { %1195 = vmatpush.msrb.mxu0 %v1171_v27 }
 0x9f3   :  { %v1116_v57 = vsel %vm304_vm3, %v1108_v37, 0.0 }
 0x9f4   :  { %1117 = vadd.xlane.f32.xlu1 %v1116_v57  ;;  %1196 = vmatpush.msrb.mxu0 %v1170_v41 }
 0x9f6   :  { %1197 = vmatpush.msrb.mxu0 %v1169_v0 }
 0x9f8   :  { %1198 = vmatpush.msrb.mxu0 %v1168_v1  ;;  %v1314_v1 = vld [vmem:[#allocation16 + $0x18] sm:$0xff] }
 0x9f9   :  { %1337 = vmatpush.msrb.mxu2 %v1314_v1 }
 0xa5f   :  { %v1115_v38 = vpop.xlane.xlu2 %1114 }
 0xa60   :  { %v1119_v58 = vmul.f32 %v1115_v38, %v2218_v19 }
 0xa62   :  { %v1121_v59 = vsub.f32 %v1107_v55, %v1119_v58  ;;  %v1512_v55 = vld [vmem:[#allocation14 + $0x1] ss:$0 sm:$0xff] }
 0xa64   :  { %v1123_v39 = vmul.f32 %v1121_v59, %v1121_v59 }
 0xa66   :  { %v1125_v60 = vsel %vm304_vm3, %v1123_v39, 0.0 }
 0xa67   :  { %1126 = vadd.xlane.f32.xlu2 %v1125_v60  ;;  %v1118_v40 = vpop.xlane.xlu1 %1117 }
 0xa68   :  { %v1120_v34 = vmul.f32 %v1118_v40, %v2218_v19 }
 0xa6a   :  { %v1122_v61 = vsub.f32 %v1108_v37, %v1120_v34 }
 0xa6c   :  { %v1124_v62 = vmul.f32 %v1122_v61, %v1122_v61 }
 0xa6e   :  { %v1128_v63 = vsel %vm304_vm3, %v1124_v62, 0.0 }
 0xa6f   :  { %1129 = vadd.xlane.f32.xlu1 %v1128_v63 }
 0xada   :  { %v1127_v2 = vpop.xlane.xlu2 %1126 }
 0xadb   :  { %v1131_v42 = vmul.f32 %v1127_v2, %v2218_v19  ;;  %v1313_v2 = vld [vmem:[#allocation16 + $0x10] sm:$0xff] }
 0xadc   :  { %1338 = vmatpush.msrb.mxu2 %v1313_v2 }
 0xadd   :  { %v1133_v3 = vadd.f32 1e-05, %v1131_v42  ;;  %v1312_v42 = vld [vmem:[#allocation16 + $0x8] sm:$0xff] }
 0xade   :  { %1339 = vmatpush.msrb.mxu2 %v1312_v42 }
 0xadf   :  { %1542 = vrsqrt.f32 %v1133_v3  ;;  %vm1141_vm7 = vweird.f32 %v1133_v3 }
 0xae2   :  { %v1130_v7 = vpop.xlane.xlu1 %1129 }
 0xae3   :  { %v1132_v8 = vmul.f32 %v1130_v7, %v2218_v19 }
 0xae5   :  { %v1543_v10 = vpop.eup %1542  ;;  %v1134_v14 = vadd.f32 1e-05, %v1132_v8 }
 0xae6   :  { %v1136_v12 = vmul.f32 %v1543_v10, %v1133_v3  ;;  %vm1142_vm6 = vweird.f32 %v1543_v10  ;;  %v1311_v3 = vld [vmem:[#allocation16] sm:$0xff] }
 0xae7   :  { %1544 = vrsqrt.f32 %v1134_v14  ;;  %vm1143_vm8 = vmor %vm1141_vm7, %vm1142_vm6  ;;  %vm1151_vm10 = vweird.f32 %v1134_v14  ;;  %1340 = vmatpush.msrb.mxu2 %v1311_v3 }
 0xae8   :  { %v1137_v13 = vmul.f32 %v1543_v10, %v1136_v12 }
 0xaea   :  { %v1138_v15 = vmul.f32 0.5, %v1137_v13 }
 0xaec   :  { %v1139_v16 = vsub.f32 1.5, %v1138_v15 }
 0xaed   :  { %v1545_v17 = vpop.eup %1544 }
 0xaee   :  { %v1140_v18 = vmul.f32 %v1543_v10, %v1139_v16  ;;  %v1146_v30 = vmul.f32 %v1545_v17, %v1134_v14  ;;  %vm1152_vm9 = vweird.f32 %v1545_v17  ;;  %v1513_v16 = vld [vmem:[#allocation8 + $0x1] ss:$0 sm:$0xff] }
 0xaef   :  { %vm1153_vm11 = vmor %vm1151_vm10, %vm1152_vm9 }
 0xaf0   :  { %v1144_v21 = vsel %vm1143_vm8, %v1543_v10, %v1140_v18  ;;  %v1147_v22 = vmul.f32 %v1545_v17, %v1146_v30  ;;  %v1514_v30 = vld [vmem:[#allocation10 + $0x1] ss:$0 sm:$0xff] }
 0xaf1   :  { %v1155_v23 = vmul.f32 %v1144_v21, %v1121_v59 }
 0xaf2   :  { %v1148_v25 = vmul.f32 0.5, %v1147_v22 }
 0xaf3   :  { %v1160_v26 = vmul.f32 %v1509_v20, %v1155_v23 }
 0xaf4   :  { %v1149_v28 = vsub.f32 1.5, %v1148_v25 }
 0xaf5   :  { %v1165_v29 = vadd.f32 %v1510_v24, %v1160_v26 }
 0xaf6   :  { %v1150_v31 = vmul.f32 %v1545_v17, %v1149_v28 }
 0xaf7   :  { %1446 = vmatmul.msk.f32.vlgmr.msrb.gmra.mxu0 %vm304_vm3, %v1165_v29 }
 0xaf8   :  { %v1154_v32 = vsel %vm1153_vm11, %v1545_v17, %v1150_v31 }
 0xaf9   :  { %v1156_v33 = vmul.f32 %v1154_v32, %v1122_v61 }
 0xafb   :  { %v1161_v43 = vmul.f32 %v1509_v20, %v1156_v33  ;;  %v1515_v33 = vld [vmem:[#allocation17] ss:$0 sm:$0xff] }
 0xafd   :  { %v1166_v44 = vadd.f32 %v1510_v24, %v1161_v43 }
 0xaff   :  { %1447 = vmatmul.msk.f32.gmra.mxu0 %vm304_vm3, %v1166_v44 }
 0xb74   :  { %v1200_v49 = vpop.f32.mrf.mxu0 }
 0xb75   :  { %v1201_v50 = vadd.f32 %v1511_v48, %v1200_v49 }
 0xb77   :  { %v1206_v51 = vmax.f32 %v1201_v50, 0.0 }
 0xb79   :  { %1456 = vmatmul.msk.f32.vlgmr.msra.gmra.mxu1 %vm465_vm4, %v1206_v51 }
 0xb7c   :  { %v1203_v52 = vpop.f32.mrf.mxu0 }
 0xb7d   :  { %v1204_v53 = vadd.f32 %v1511_v48, %v1203_v52 }
 0xb7f   :  { %v1207_v54 = vmax.f32 %v1204_v53, 0.0 }
 0xb81   :  { %1457 = vmatmul.msk.f32.vlgmr.msra.gmra.mxu3 %vm465_vm4, %v1207_v54 }
 0xbf6   :  { %v1245_v35 = vpop.f32.mrf.mxu1 }
 0xbf7   :  { %v1246_v56 = vadd.f32 %v1512_v55, %v1245_v35 }
 0xbf9   :  { %v1251_v36 = vadd.f32 %v1246_v56, %v1165_v29 }
 0xbfb   :  { %v1257_v37 = vsel %vm304_vm3, %v1251_v36, 0.0 }
 0xbfc   :  { %1258 = vadd.xlane.f32.xlu2 %v1257_v37 }
 0xc04   :  { %v1248_v57 = vpop.f32.mrf.mxu3 }
 0xc05   :  { %v1249_v38 = vadd.f32 %v1512_v55, %v1248_v57 }
 0xc07   :  { %v1252_v58 = vadd.f32 %v1249_v38, %v1166_v44 }
 0xc09   :  { %v1260_v59 = vsel %vm304_vm3, %v1252_v58, 0.0 }
 0xc0a   :  { %1261 = vadd.xlane.f32.xlu0 %v1260_v59 }
 0xc6f   :  { %v1259_v39 = vpop.xlane.xlu2 %1258 }
 0xc70   :  { %v1263_v60 = vmul.f32 %v1259_v39, %v2218_v19 }
 0xc72   :  { %v1265_v40 = vsub.f32 %v1251_v36, %v1263_v60 }
 0xc74   :  { %v1267_v34 = vmul.f32 %v1265_v40, %v1265_v40 }
 0xc76   :  { %v1269_v61 = vsel %vm304_vm3, %v1267_v34, 0.0 }
 0xc77   :  { %1270 = vadd.xlane.f32.xlu1 %v1269_v61 }
 0xc7d   :  { %v1262_v62 = vpop.xlane.xlu0 %1261 }
 0xc7e   :  { %v1264_v63 = vmul.f32 %v1262_v62, %v2218_v19 }
 0xc80   :  { %v1266_v27 = vsub.f32 %v1252_v58, %v1264_v63 }
 0xc82   :  { %v1268_v41 = vmul.f32 %v1266_v27, %v1266_v27 }
 0xc84   :  { %v1272_v0 = vsel %vm304_vm3, %v1268_v41, 0.0 }
 0xc85   :  { %1273 = vadd.xlane.f32.xlu2 %v1272_v0 }
 0xcea   :  { %v1271_v4 = vpop.xlane.xlu1 %1270 }
 0xceb   :  { %v1275_v5 = vmul.f32 %v1271_v4, %v2218_v19 }
 0xced   :  { %v1277_v6 = vadd.f32 1e-05, %v1275_v5 }
 0xcef   :  { %1546 = vrsqrt.f32 %v1277_v6  ;;  %vm1285_vm12 = vweird.f32 %v1277_v6 }
 0xcf5   :  { %v1547_v7 = vpop.eup %1546 }
 0xcf6   :  { %v1280_v8 = vmul.f32 %v1547_v7, %v1277_v6  ;;  %vm1286_vm4 = vweird.f32 %v1547_v7 }
 0xcf7   :  { %vm1287_vm13 = vmor %vm1285_vm12, %vm1286_vm4 }
 0xcf8   :  { %v1281_v9 = vmul.f32 %v1547_v7, %v1280_v8  ;;  %v1274_v10 = vpop.xlane.xlu2 %1273 }
 0xcf9   :  { %v1276_v14 = vmul.f32 %v1274_v10, %v2218_v19 }
 0xcfa   :  { %v1282_v11 = vmul.f32 0.5, %v1281_v9 }
 0xcfb   :  { %v1278_v12 = vadd.f32 1e-05, %v1276_v14 }
 0xcfc   :  { %v1283_v13 = vsub.f32 1.5, %v1282_v11 }
 0xcfd   :  { %1548 = vrsqrt.f32 %v1278_v12  ;;  %vm1295_vm15 = vweird.f32 %v1278_v12 }
 0xcfe   :  { %v1284_v15 = vmul.f32 %v1547_v7, %v1283_v13 }
 0xd00   :  { %v1288_v17 = vsel %vm1287_vm13, %v1547_v7, %v1284_v15 }
 0xd01   :  { %v1299_v18 = vmul.f32 %v1288_v17, %v1265_v40 }
 0xd03   :  { %v1549_v20 = vpop.eup %1548  ;;  %v1304_v21 = vmul.f32 %v1513_v16, %v1299_v18 }
 0xd04   :  { %v1290_v22 = vmul.f32 %v1549_v20, %v1278_v12  ;;  %vm1296_vm14 = vweird.f32 %v1549_v20 }
 0xd05   :  { %v1309_v23 = vadd.f32 %v1514_v30, %v1304_v21  ;;  %vm1297_vm0 = vmor %vm1295_vm15, %vm1296_vm14 }
 0xd06   :  { %v1291_v24 = vmul.f32 %v1549_v20, %v1290_v22 }
 0xd07   :  { %1458 = vmatmul.msk.f32.vlgmr.msrb.gmra.mxu2 %vm304_vm3, %v1309_v23 }
 0xd08   :  { %v1292_v19 = vmul.f32 0.5, %v1291_v24 }
 0xd0a   :  { %v1293_v25 = vsub.f32 1.5, %v1292_v19 }
 0xd0c   :  { %v1294_v26 = vmul.f32 %v1549_v20, %v1293_v25 }
 0xd0e   :  { %v1298_v28 = vsel %vm1297_vm0, %v1549_v20, %v1294_v26 }
 0xd0f   :  { %v1300_v29 = vmul.f32 %v1298_v28, %v1266_v27 }
 0xd11   :  { %v1305_v31 = vmul.f32 %v1513_v16, %v1300_v29 }
 0xd13   :  { %v1310_v32 = vadd.f32 %v1514_v30, %v1305_v31 }
 0xd15   :  { %1459 = vmatmul.msk.f32.gmra.mxu2 %vm304_vm3, %v1310_v32 }
 0xd8a   :  { %v1342_v43 = vpop.f32.mrf.mxu2 }
 0xd8b   :  { %v1343_v44 = vadd.f32 %v1515_v33, %v1342_v43 }
 0xd8d   :  { %1348 = vst [vmem:[#allocation19] sm:$0xff] %v1343_v44 }
 0xd98   :  { %v1345_v45 = vpop.f32.mrf.mxu2 }
 0xd99   :  { %v1346_v46 = vadd.f32 %v1515_v33, %v1345_v45 }
 0xd9b   :  { %1349 = vst [vmem:[#allocation19 + $0x8] sm:$0xff] %v1346_v46 }
 0xd9c   :  { %1362 = dma.vmem_to_hbm [thread:$0]  %s1355_s10, 256, %s1357_s1, [#allocation4], %s1833_s25, %s1833_s25, %s1834_s5  }
 0xd9d   :  { %1826 = dma.done.wait [#allocation4], 256  }
 0xd9e   :  { %1827 = vsyncadd [#allocation4], 4294967040 }
 0xd9f   :  { %1367 = vsyncpa [#allocation3], 1 }
 0xda0   :  { %1368 = vsyncpa [#allocation6], 1 }
 0xda1   :  { %1369 = vsyncpa [#allocation9], 1 }
 0xda2   :  { %1370 = vsyncpa [#allocation12], 1 }
 0xda3   :  { %1371 = vsyncpa [#allocation15], 1 }
 0xda4   :  { %1372 = vsyncpa [#allocation18], 1 }
 0xda5   :  { %1373 = vsyncpa [#allocation4], 1 }

</bundles_post_ra>
